<compile_context>
chip_gen: v5e
topology: v5e:2x2
jax: 0.10.0
libtpu: 0.0.40
codegen_flags: <defaults>
</compile_context>

<pallas_src>
import jax
import jax.numpy as jnp
from jax.experimental import pallas as pl
from jax.experimental.pallas import tpu as pltpu


def _mlp_kernel(x_ref, w1_ref, b1_ref, w2_ref, b2_ref, w4_ref, b4_ref,
                w3t_ref, b3_ref, o_ref):
    x = x_ref[...]                                       # [tb, 1] f32

    # Layer 1 (fc1): D_in == 1 -> broadcast outer product on the VPU.
    h = x * w1_ref[...] + b1_ref[...]                    # [tb, Hp] f32
    h = jnp.maximum(h, 0.0)

    # Layer 2 (fc2): HxH matmul, bf16 (or f32) operands, f32 accumulation.
    h = jnp.dot(h.astype(w2_ref.dtype), w2_ref[...],
                preferred_element_type=jnp.float32) + b2_ref[...]
    h = jnp.maximum(h, 0.0)

    # Layer 3 (fc4): HxH matmul, bf16 (or f32) operands, f32 accumulation.
    h = jnp.dot(h.astype(w4_ref.dtype), w4_ref[...],
                preferred_element_type=jnp.float32) + b4_ref[...]
    h = jnp.maximum(h, 0.0)

    # Layer 4 (fc3): D_out == 1 -> VPU multiply + lane reduce (XLU), scalar bias
    # from SMEM.  Avoids a degenerate N=1 MXU pass.
    out = jnp.sum(h * w3t_ref[...], axis=-1, keepdims=True) + b3_ref[0, 0]
    o_ref[...] = out.astype(o_ref.dtype)


def prepare_params(params, *, use_bf16=True):
    """Pad the hidden dim to a multiple of 128 and pre-cast the HxH weights.

    Zero padding is mathematically inert: padded w1 columns produce zero
    pre-activation + zero bias -> ReLU(0)=0, which contributes nothing through
    the (zero) padded rows of w2/w4/w3.  Output is bit-identical to unpadded.
    """
    D_in = params["w1"].shape[0]
    D_out = params["w3"].shape[1]
    assert D_in == 1 and D_out == 1, "kernel is specialized for D_in=D_out=1"

    H = params["w1"].shape[1]
    Hp = ((H + 127) // 128) * 128
    mx = jnp.bfloat16 if use_bf16 else jnp.float32

    def pad_c(a):
        return jnp.pad(a, ((0, 0), (0, Hp - a.shape[1])))

    def pad_r(a):
        return jnp.pad(a, ((0, Hp - a.shape[0]), (0, 0)))

    return dict(
        w1=pad_c(params["w1"]),                     # [1, Hp]  f32 (VPU)
        b1=pad_c(params["b1"]),                     # [1, Hp]  f32
        w2=pad_c(pad_r(params["w2"])).astype(mx),   # [Hp, Hp] bf16/f32 (MXU)
        b2=pad_c(params["b2"]),                     # [1, Hp]  f32
        w4=pad_c(pad_r(params["w4"])).astype(mx),   # [Hp, Hp] bf16/f32 (MXU)
        b4=pad_c(params["b4"]),                     # [1, Hp]  f32
        w3t=pad_c(params["w3"].T),                  # [1, Hp]  f32 (VPU reduce)
        b3=params["b3"].reshape(1, 1),              # [1, 1]   f32 (SMEM scalar)
        hp=Hp,
        d_in=D_in,
        d_out=D_out,
    )


def trignn_forward(x, p, *, block_b=256):
    """x: [B, 1] float32.  p: output of prepare_params."""
    B, D_in = x.shape
    assert D_in == p["d_in"]
    Hp, D_out = p["hp"], p["d_out"]

    # Batch tile: multiple of 8 sublanes, capped at block_b; pad B so the tile
    # divides the (padded) batch evenly.  Padded rows are sliced off below.
    tb = min(block_b, max(8, ((B + 7) // 8) * 8))
    Bp = ((B + tb - 1) // tb) * tb
    xp = jnp.pad(x, ((0, Bp - B), (0, 0))) if Bp != B else x

    vmem = pltpu.MemorySpace.VMEM

    def resident(shape):
        # Constant block index across the batch grid -> fetched once, stays
        # VMEM-resident for every grid step.
        return pl.BlockSpec(shape, lambda i: (0, 0), memory_space=vmem)

    out = pl.pallas_call(
        _mlp_kernel,
        out_shape=jax.ShapeDtypeStruct((Bp, D_out), jnp.float32),
        grid=(Bp // tb,),
        in_specs=[
            pl.BlockSpec((tb, D_in), lambda i: (i, 0), memory_space=vmem),  # x
            resident((1, Hp)),                                              # w1
            resident((1, Hp)),                                              # b1
            resident((Hp, Hp)),                                             # w2
            resident((1, Hp)),                                              # b2
            resident((Hp, Hp)),                                             # w4
            resident((1, Hp)),                                              # b4
            resident((1, Hp)),                                              # w3t
            pl.BlockSpec(memory_space=pltpu.MemorySpace.SMEM),              # b3
        ],
        out_specs=pl.BlockSpec((tb, D_out), lambda i: (i, 0), memory_space=vmem),
        compiler_params=pltpu.CompilerParams(
            dimension_semantics=("parallel",)),  # batch tiles shard across TCs
    )(xp, p["w1"], p["b1"], p["w2"], p["b2"], p["w4"], p["b4"], p["w3t"], p["b3"])
    return out[:B]


def init_params(key, D_in=1, H=300, D_out=1):
    """Deterministic init mimicking PyTorch nn.Linear default (U[-1/sqrt(in), 1/sqrt(in)])."""
    keys = jax.random.split(key, 8)

    def linear(kw, kb, fan_in, fan_out):
        bound = 1.0 / jnp.sqrt(jnp.float32(fan_in))
        w = jax.random.uniform(kw, (fan_in, fan_out), jnp.float32, -bound, bound)
        b = jax.random.uniform(kb, (1, fan_out), jnp.float32, -bound, bound)
        return w, b

    w1, b1 = linear(keys[0], keys[1], D_in, H)
    w2, b2 = linear(keys[2], keys[3], H, H)
    w4, b4 = linear(keys[4], keys[5], H, H)
    w3, b3 = linear(keys[6], keys[7], H, D_out)
    return dict(w1=w1, b1=b1, w2=w2, b2=b2, w4=w4, b4=b4, w3=w3, b3=b3)


def trignn_ref(x, p):
    """Pure-f32 reference (matches the PyTorch forward)."""
    h = jnp.maximum(x @ p["w1"] + p["b1"], 0.0)
    h = jnp.maximum(h @ p["w2"] + p["b2"], 0.0)
    h = jnp.maximum(h @ p["w4"] + p["b4"], 0.0)
    return h @ p["w3"] + p["b3"]


def trignn_ref_bf16(x, p):
    """Reference that mimics the kernel's bf16-operand / f32-accumulation MXU path."""
    bf = jnp.bfloat16
    h = jnp.maximum(x * p["w1"] + p["b1"], 0.0)
    h = jnp.maximum(jnp.dot(h.astype(bf), p["w2"].astype(bf),
                            preferred_element_type=jnp.float32) + p["b2"], 0.0)
    h = jnp.maximum(jnp.dot(h.astype(bf), p["w4"].astype(bf),
                            preferred_element_type=jnp.float32) + p["b4"], 0.0)
    return h @ p["w3"] + p["b3"]


if __name__ == "__main__":
    D_in, H, D_out = 1, 300, 1

    key = jax.random.PRNGKey(0)
    k_params, k_x1, k_x2 = jax.random.split(key, 3)
    params = init_params(k_params, D_in, H, D_out)

    # Small batch, single grid step.
    x = jax.random.normal(k_x1, (64, D_in), jnp.float32)

    # 1) Pure-f32 path vs. exact f32 reference (tight tolerance).
    p_f32 = prepare_params(params, use_bf16=False)
    out_f32 = jax.block_until_ready(trignn_forward(x, p_f32))
    ref_f32 = trignn_ref(x, params)
    assert out_f32.shape == (64, D_out), out_f32.shape
    assert jnp.allclose(out_f32, ref_f32, atol=1e-4, rtol=1e-4), "f32 mismatch"

    # 2) bf16-MXU path vs. a reference applying the same operand rounding.
    p_bf16 = prepare_params(params, use_bf16=True)
    out_bf16 = jax.block_until_ready(trignn_forward(x, p_bf16))
    ref_bf16 = trignn_ref_bf16(x, params)
    assert jnp.allclose(out_bf16, ref_bf16, atol=1e-2, rtol=1e-2), "bf16 mismatch"

    # 3) Larger batch: exercises batch padding, a multi-step grid with
    #    VMEM-resident weights, and the "parallel" megacore split.
    xb = jax.random.normal(k_x2, (500, D_in), jnp.float32)
    out_b = jax.block_until_ready(trignn_forward(xb, p_bf16, block_b=256))
    ref_b = trignn_ref_bf16(xb, params)
    assert out_b.shape == (500, D_out), out_b.shape
    assert jnp.allclose(out_b, ref_b, atol=1e-2, rtol=1e-2), "batched mismatch"

    print("KERNEL_OK")
</pallas_src>

<mosaic_0001>
module attributes {stable_mosaic.version = 11 : i64} {
  func.func @_mlp_kernel(%arg0: i32, %arg1: memref<64x1xf32, #tpu.memory_space<vmem>>, %arg2: memref<1x384xf32, #tpu.memory_space<vmem>>, %arg3: memref<1x384xf32, #tpu.memory_space<vmem>>, %arg4: memref<384x384xf32, #tpu.memory_space<vmem>>, %arg5: memref<1x384xf32, #tpu.memory_space<vmem>>, %arg6: memref<384x384xf32, #tpu.memory_space<vmem>>, %arg7: memref<1x384xf32, #tpu.memory_space<vmem>>, %arg8: memref<1x384xf32, #tpu.memory_space<vmem>>, %arg9: memref<1x1xf32, #tpu.memory_space<smem>>, %arg10: memref<64x1xf32, #tpu.memory_space<vmem>>) attributes {dimension_semantics = [#tpu.dimension_semantics<parallel>], iteration_bounds = array<i64: 1>, scalar_prefetch = 0 : i64, scratch_operands = 0 : i64, tpu.core_type = #tpu.core_type<tc>, window_params = [{transform_indices = @transform_0, window_bounds = array<i64: 64, 1>}, {pipeline_mode = #tpu.pipeline_mode<synchronous>, transform_indices = @transform_1, window_bounds = array<i64: 1, 384>}, {pipeline_mode = #tpu.pipeline_mode<synchronous>, transform_indices = @transform_2, window_bounds = array<i64: 1, 384>}, {pipeline_mode = #tpu.pipeline_mode<synchronous>, transform_indices = @transform_3, window_bounds = array<i64: 384, 384>}, {pipeline_mode = #tpu.pipeline_mode<synchronous>, transform_indices = @transform_4, window_bounds = array<i64: 1, 384>}, {pipeline_mode = #tpu.pipeline_mode<synchronous>, transform_indices = @transform_5, window_bounds = array<i64: 384, 384>}, {pipeline_mode = #tpu.pipeline_mode<synchronous>, transform_indices = @transform_6, window_bounds = array<i64: 1, 384>}, {pipeline_mode = #tpu.pipeline_mode<synchronous>, transform_indices = @transform_7, window_bounds = array<i64: 1, 384>}, {transform_indices = @transform_8, window_bounds = array<i64: 1, 1>}, {transform_indices = @transform_9, window_bounds = array<i64: 64, 1>}]} {
    %c0 = arith.constant 0 : index
    %c0_0 = arith.constant 0 : index
    %0 = vector.load %arg1[%c0, %c0_0] : memref<64x1xf32, #tpu.memory_space<vmem>>, vector<64x1xf32>
    %c0_1 = arith.constant 0 : index
    %c0_2 = arith.constant 0 : index
    %1 = vector.load %arg2[%c0_1, %c0_2] : memref<1x384xf32, #tpu.memory_space<vmem>>, vector<1x384xf32>
    %2 = vector.broadcast %0 : vector<64x1xf32> to vector<64x384xf32>
    %3 = vector.broadcast %1 : vector<1x384xf32> to vector<64x384xf32>
    %4 = arith.mulf %2, %3 : vector<64x384xf32>
    %c0_3 = arith.constant 0 : index
    %c0_4 = arith.constant 0 : index
    %5 = vector.load %arg3[%c0_3, %c0_4] : memref<1x384xf32, #tpu.memory_space<vmem>>, vector<1x384xf32>
    %6 = vector.broadcast %5 : vector<1x384xf32> to vector<64x384xf32>
    %7 = arith.addf %4, %6 : vector<64x384xf32>
    %cst = arith.constant 0.000000e+00 : f32
    %8 = vector.broadcast %cst : f32 to vector<64x384xf32>
    %9 = arith.maximumf %7, %8 : vector<64x384xf32>
    %c0_5 = arith.constant 0 : index
    %c0_6 = arith.constant 0 : index
    %10 = vector.load %arg4[%c0_5, %c0_6] : memref<384x384xf32, #tpu.memory_space<vmem>>, vector<384x384xf32>
    %cst_7 = arith.constant dense<0.000000e+00> : vector<64x384xf32>
    %11 = tpu.matmul %9, %10, %cst_7 {dimension_numbers = #tpu.dot_dimension_numbers<[1], [0], [0], [1], [0, 0, 1, 1], [], []>} : vector<64x384xf32>, vector<384x384xf32>, vector<64x384xf32> -> vector<64x384xf32>
    %c0_8 = arith.constant 0 : index
    %c0_9 = arith.constant 0 : index
    %12 = vector.load %arg5[%c0_8, %c0_9] : memref<1x384xf32, #tpu.memory_space<vmem>>, vector<1x384xf32>
    %13 = vector.broadcast %12 : vector<1x384xf32> to vector<64x384xf32>
    %14 = arith.addf %11, %13 : vector<64x384xf32>
    %cst_10 = arith.constant 0.000000e+00 : f32
    %15 = vector.broadcast %cst_10 : f32 to vector<64x384xf32>
    %16 = arith.maximumf %14, %15 : vector<64x384xf32>
    %c0_11 = arith.constant 0 : index
    %c0_12 = arith.constant 0 : index
    %17 = vector.load %arg6[%c0_11, %c0_12] : memref<384x384xf32, #tpu.memory_space<vmem>>, vector<384x384xf32>
    %cst_13 = arith.constant dense<0.000000e+00> : vector<64x384xf32>
    %18 = tpu.matmul %16, %17, %cst_13 {dimension_numbers = #tpu.dot_dimension_numbers<[1], [0], [0], [1], [0, 0, 1, 1], [], []>} : vector<64x384xf32>, vector<384x384xf32>, vector<64x384xf32> -> vector<64x384xf32>
    %c0_14 = arith.constant 0 : index
    %c0_15 = arith.constant 0 : index
    %19 = vector.load %arg7[%c0_14, %c0_15] : memref<1x384xf32, #tpu.memory_space<vmem>>, vector<1x384xf32>
    %20 = vector.broadcast %19 : vector<1x384xf32> to vector<64x384xf32>
    %21 = arith.addf %18, %20 : vector<64x384xf32>
    %cst_16 = arith.constant 0.000000e+00 : f32
    %22 = vector.broadcast %cst_16 : f32 to vector<64x384xf32>
    %23 = arith.maximumf %21, %22 : vector<64x384xf32>
    %c0_17 = arith.constant 0 : index
    %c0_18 = arith.constant 0 : index
    %24 = vector.load %arg8[%c0_17, %c0_18] : memref<1x384xf32, #tpu.memory_space<vmem>>, vector<1x384xf32>
    %25 = vector.broadcast %24 : vector<1x384xf32> to vector<64x384xf32>
    %26 = arith.mulf %23, %25 : vector<64x384xf32>
    %cst_19 = arith.constant dense<0.000000e+00> : vector<64xf32>
    %27 = vector.multi_reduction <add>, %26, %cst_19 [1] : vector<64x384xf32> to vector<64xf32>
    %28 = vector.shape_cast %27 : vector<64xf32> to vector<64x1xf32>
    %c0_20 = arith.constant 0 : index
    %c0_21 = arith.constant 0 : index
    %29 = memref.load %arg9[%c0_20, %c0_21] : memref<1x1xf32, #tpu.memory_space<smem>>
    %30 = vector.broadcast %29 : f32 to vector<64x1xf32>
    %31 = arith.addf %28, %30 : vector<64x1xf32>
    %c0_22 = arith.constant 0 : index
    %c0_23 = arith.constant 0 : index
    %32 = vector.load %arg10[%c0_22, %c0_23] : memref<64x1xf32, #tpu.memory_space<vmem>>, vector<64x1xf32>
    tpu.vector_store %arg10[%c0_22, %c0_23], %31 {strides = array<i32>} : memref<64x1xf32, #tpu.memory_space<vmem>>, vector<64x1xf32>,
    return
  }
  func.func @transform_0(%arg0: i32) -> (i32, i32) {
    %c0_i32 = arith.constant 0 : i32
    %c0_i32_0 = arith.constant 0 : i32
    return %arg0, %c0_i32 : i32, i32
  }
  func.func @transform_1(%arg0: i32) -> (i32, i32) {
    %c0_i32 = arith.constant 0 : i32
    %c0_i32_0 = arith.constant 0 : i32
    %c0_i32_1 = arith.constant 0 : i32
    return %c0_i32, %c0_i32_0 : i32, i32
  }
  func.func @transform_2(%arg0: i32) -> (i32, i32) {
    %c0_i32 = arith.constant 0 : i32
    %c0_i32_0 = arith.constant 0 : i32
    %c0_i32_1 = arith.constant 0 : i32
    return %c0_i32, %c0_i32_0 : i32, i32
  }
  func.func @transform_3(%arg0: i32) -> (i32, i32) {
    %c0_i32 = arith.constant 0 : i32
    %c0_i32_0 = arith.constant 0 : i32
    %c0_i32_1 = arith.constant 0 : i32
    return %c0_i32, %c0_i32_0 : i32, i32
  }
  func.func @transform_4(%arg0: i32) -> (i32, i32) {
    %c0_i32 = arith.constant 0 : i32
    %c0_i32_0 = arith.constant 0 : i32
    %c0_i32_1 = arith.constant 0 : i32
    return %c0_i32, %c0_i32_0 : i32, i32
  }
  func.func @transform_5(%arg0: i32) -> (i32, i32) {
    %c0_i32 = arith.constant 0 : i32
    %c0_i32_0 = arith.constant 0 : i32
    %c0_i32_1 = arith.constant 0 : i32
    return %c0_i32, %c0_i32_0 : i32, i32
  }
  func.func @transform_6(%arg0: i32) -> (i32, i32) {
    %c0_i32 = arith.constant 0 : i32
    %c0_i32_0 = arith.constant 0 : i32
    %c0_i32_1 = arith.constant 0 : i32
    return %c0_i32, %c0_i32_0 : i32, i32
  }
  func.func @transform_7(%arg0: i32) -> (i32, i32) {
    %c0_i32 = arith.constant 0 : i32
    %c0_i32_0 = arith.constant 0 : i32
    %c0_i32_1 = arith.constant 0 : i32
    return %c0_i32, %c0_i32_0 : i32, i32
  }
  func.func @transform_8(%arg0: i32) -> (i32, i32) {
    %c0_i32 = arith.constant 0 : i32
    %c0_i32_0 = arith.constant 0 : i32
    %c0_i32_1 = arith.constant 0 : i32
    return %c0_i32, %c0_i32_0 : i32, i32
  }
  func.func @transform_9(%arg0: i32) -> (i32, i32) {
    %c0_i32 = arith.constant 0 : i32
    %c0_i32_0 = arith.constant 0 : i32
    return %arg0, %c0_i32 : i32, i32
  }
}

</mosaic_0001>

<bundles_post_ra>
// kernel: tpu_custom_call.1
= control target key start
LH: loop header
LB: loop body
LE: loop exit
PB: predicated region body
PF: predicated region fallthrough
CT: control target
= control target key end

     0   :  { %15 = vsyncpa [#allocation4], 0  ;;  %s2139_s0 = inlined_call_operand.vmem [shape: f32[64,1], index: 0, kind: input, shape index: {}]   ;;  %s2140_s1 = inlined_call_operand.vmem [shape: f32[1,384], index: 1, kind: input, shape index: {}]   ;;  %s2141_s2 = inlined_call_operand.vmem [shape: f32[1,384], index: 2, kind: input, shape index: {}]   ;;  %s2142_s3 = inlined_call_operand.hbm [shape: f32[384,384], index: 3, kind: input, shape index: {}]   ;;  %s2143_s4 = inlined_call_operand.vmem [shape: f32[1,384], index: 4, kind: input, shape index: {}]   ;;  %s2144_s5 = inlined_call_operand.hbm [shape: f32[384,384], index: 5, kind: input, shape index: {}]   ;;  %s2145_s6 = inlined_call_operand.vmem [shape: f32[1,384], index: 6, kind: input, shape index: {}]   ;;  %s2146_s7 = inlined_call_operand.vmem [shape: f32[1,384], index: 7, kind: input, shape index: {}]   ;;  %s2147_s8 = inlined_call_operand.<no memory space> [shape: f32[1,1], index: 8, kind: input, shape index: {}]   ;;  %s2148_s9 = inlined_call_operand.vmem [shape: f32[64,1], index: 9, kind: output, shape index: {}]  }
   0x1   :  { %s27_s11 = sshll.u32 %s2142_s3, 4  ;;  %s28_s11 = int_to_ptr.hbm [resolvable:$true] %s27_s11 }
   0x2   :  { %16 = vsyncpa [#allocation6], 0  ;;  %s1472_s12 = smov [#allocation3]   ;;  %s42_s16 = sshll.u32 %s2144_s5, 4  ;;  %s43_s16 = int_to_ptr.hbm [resolvable:$true] %s42_s16 }
   0x3   :  { %s29_s13 = sshll.u32 %s1472_s12, 4  ;;  %s1473_s17 = smov 384   ;;  %s30_s13 = int_to_ptr.vmem [resolvable:$true] %s29_s13 }
   0x4   :  { %s1474_s18 = smov 24   ;;  %s1475_s19 = smov [#allocation5]  }
   0x5   :  { %35 = dma.hbm_to_vmem [thread:$0]  %s28_s11, 18432, %s30_s13, [#allocation4], %s1473_s17, %s1473_s17, %s1474_s18  }
   0x6   :  { %s44_s20 = sshll.u32 %s1475_s19, 4  ;;  %s45_s20 = int_to_ptr.vmem [resolvable:$true] %s44_s20 }
   0x7   :  { %50 = dma.hbm_to_vmem [thread:$0]  %s43_s16, 18432, %s45_s20, [#allocation6], %s1473_s17, %s1473_s17, %s1474_s18  }
   0x8   :  { %1468 = dma.done.wait [#allocation4], 18432  }
   0x9   :  { %1469 = vsyncadd [#allocation4], 4294948864 }
   0xa   :  { %1470 = dma.done.wait [#allocation6], 18432  }
   0xb   :  { %1471 = vsyncadd [#allocation6], 4294948864  ;;  %v1476_v0 = vmov 0   ;;  %v69_v1 = vld [vmem:[%s2139_s0 + $0x20] sm:$0xff]  ;;  %v66_v3 = vld [vmem:[%s2139_s0 + $0x8] sm:$0xff]  ;;  %vm1365_vm0 = vcmask 7168  }
   0xc   :  { %1418 = vset.pattern.permute.xlu1 %v1476_v0  ;;  %1417 = vset.pattern.permute.xlu0 %v1476_v0  ;;  %v65_v2 = vld [vmem:[%s2139_s0] sm:$0xff]  ;;  %v246_v4 = vld [vmem:[#allocation3 + $0x168] sm:$0xff]  ;;  %v243_v6 = vld [vmem:[#allocation3 + $0x150] sm:$0xff] }
   0xd   :  { %1419 = vset.pattern.permute.xlu2 %v1476_v0  ;;  %96 = vperm.xlu0 %1417, %v69_v1   ;;  %v294_v5 = vld [vmem:[#allocation3 + $0x2e8] sm:$0xff]  ;;  %v291_v7 = vld [vmem:[#allocation3 + $0x2d0] sm:$0xff]  ;;  %v240_v8 = vld [vmem:[#allocation3 + $0x138] sm:$0xff] }
   0xe   :  { %76 = vperm.xlu1 %1418, %v65_v2   ;;  %81 = vperm.xlu2 %1419, %v66_v3   ;;  %v288_v9 = vld [vmem:[#allocation3 + $0x2b8] sm:$0xff]  ;;  %v70_v10 = vld [vmem:[%s2139_s0 + $0x28] sm:$0xff]  ;;  %v71_v11 = vld [vmem:[%s2139_s0 + $0x30] sm:$0xff] }
   0xf   :  { %353 = vmatpush.msra.mxu0 %v246_v4  ;;  %1380 = vmatpush.msra.mxu2 %v246_v4  ;;  %v237_v12 = vld [vmem:[#allocation3 + $0x120] sm:$0xff]  ;;  %v72_v13 = vld [vmem:[%s2139_s0 + $0x38] sm:$0xff]  ;;  %v234_v15 = vld [vmem:[#allocation3 + $0x108] sm:$0xff] }
  0x10   :  { %394 = vmatpush.msra.mxu1 %v294_v5  ;;  %1396 = vmatpush.msra.mxu3 %v294_v5  ;;  %v285_v14 = vld [vmem:[#allocation3 + $0x2a0] sm:$0xff]  ;;  %v282_v16 = vld [vmem:[#allocation3 + $0x288] sm:$0xff]  ;;  %v231_v17 = vld [vmem:[#allocation3 + $0xf0] sm:$0xff] }
  0x11   :  { %354 = vmatpush.msra.mxu0 %v243_v6  ;;  %1381 = vmatpush.msra.mxu2 %v243_v6  ;;  %v279_v18 = vld [vmem:[#allocation3 + $0x270] sm:$0xff]  ;;  %v68_v20 = vld [vmem:[%s2139_s0 + $0x18] sm:$0xff]  ;;  %v225_v23 = vld [vmem:[#allocation3 + $0xc0] sm:$0xff] }
  0x12   :  { %395 = vmatpush.msra.mxu1 %v291_v7  ;;  %1397 = vmatpush.msra.mxu3 %v291_v7  ;;  %v67_v19 = vld [vmem:[%s2139_s0 + $0x10] sm:$0xff]  ;;  %v228_v21 = vld [vmem:[#allocation3 + $0xd8] sm:$0xff]  ;;  %v273_v24 = vld [vmem:[#allocation3 + $0x240] sm:$0xff] }
  0x13   :  { %355 = vmatpush.msra.mxu0 %v240_v8  ;;  %1382 = vmatpush.msra.mxu2 %v240_v8  ;;  %v276_v22 = vld [vmem:[#allocation3 + $0x258] sm:$0xff]  ;;  %v222_v25 = vld [vmem:[#allocation3 + $0xa8] sm:$0xff]  ;;  %v219_v27 = vld [vmem:[#allocation3 + $0x90] sm:$0xff] }
  0x14   :  { %396 = vmatpush.msra.mxu1 %v288_v9  ;;  %1398 = vmatpush.msra.mxu3 %v288_v9  ;;  %v270_v26 = vld [vmem:[#allocation3 + $0x228] sm:$0xff]  ;;  %v267_v28 = vld [vmem:[#allocation3 + $0x210] sm:$0xff]  ;;  %v216_v29 = vld [vmem:[#allocation3 + $0x78] sm:$0xff] }
  0x15   :  { %101 = vperm.xlu0 %1417, %v70_v10   ;;  %356 = vmatpush.msra.mxu0 %v237_v12  ;;  %v264_v30 = vld [vmem:[#allocation3 + $0x1f8] sm:$0xff]  ;;  %v213_v31 = vld [vmem:[#allocation3 + $0x60] sm:$0xff]  ;;  %v210_v33 = vld [vmem:[#allocation3 + $0x48] sm:$0xff] }
  0x16   :  { %106 = vperm.xlu1 %1418, %v71_v11   ;;  %111 = vperm.xlu2 %1419, %v72_v13   ;;  %v261_v32 = vld [vmem:[#allocation3 + $0x1e0] sm:$0xff]  ;;  %v258_v34 = vld [vmem:[#allocation3 + $0x1c8] sm:$0xff]  ;;  %v207_v35 = vld [vmem:[#allocation3 + $0x30] sm:$0xff] }
  0x17   :  { %1383 = vmatpush.msra.mxu2 %v237_v12  ;;  %397 = vmatpush.msra.mxu1 %v285_v14  ;;  %v255_v36 = vld [vmem:[#allocation3 + $0x1b0] sm:$0xff]  ;;  %v204_v37 = vld [vmem:[#allocation3 + $0x18] sm:$0xff]  ;;  %v201_v39 = vld [vmem:[#allocation3] sm:$0xff] }
  0x18   :  { %1399 = vmatpush.msra.mxu3 %v285_v14  ;;  %357 = vmatpush.msra.mxu0 %v234_v15  ;;  %v252_v38 = vld [vmem:[#allocation3 + $0x198] sm:$0xff]  ;;  %v249_v40 = vld [vmem:[#allocation3 + $0x180] sm:$0xff]  ;;  %v342_v41 = vld [vmem:[#allocation3 + $0x468] sm:$0xff] }
  0x19   :  { %1384 = vmatpush.msra.mxu2 %v234_v15  ;;  %398 = vmatpush.msra.mxu1 %v282_v16  ;;  %v247_v42 = vld [vmem:[#allocation3 + $0x170] sm:$0xff]  ;;  %v244_v46 = vld [vmem:[#allocation3 + $0x158] sm:$0xff]  ;;  %v241_v50 = vld [vmem:[#allocation3 + $0x140] sm:$0xff] }
  0x1a   :  { %1400 = vmatpush.msra.mxu3 %v282_v16  ;;  %358 = vmatpush.msra.mxu0 %v231_v17  ;;  %v295_v43 = vld [vmem:[#allocation3 + $0x2f0] sm:$0xff]  ;;  %v292_v47 = vld [vmem:[#allocation3 + $0x2d8] sm:$0xff]  ;;  %v289_v51 = vld [vmem:[#allocation3 + $0x2c0] sm:$0xff] }
  0x1b   :  { %1385 = vmatpush.msra.mxu2 %v231_v17  ;;  %399 = vmatpush.msra.mxu1 %v279_v18  ;;  %v343_v44 = vld [vmem:[#allocation3 + $0x470] sm:$0xff]  ;;  %v340_v48 = vld [vmem:[#allocation3 + $0x458] sm:$0xff]  ;;  %v337_v52 = vld [vmem:[#allocation3 + $0x440] sm:$0xff] }
  0x1c   :  { %1401 = vmatpush.msra.mxu3 %v279_v18  ;;  %359 = vmatpush.msra.mxu0 %v228_v21  ;;  %v339_v45 = vld [vmem:[#allocation3 + $0x450] sm:$0xff]  ;;  %v336_v49 = vld [vmem:[#allocation3 + $0x438] sm:$0xff]  ;;  %v333_v53 = vld [vmem:[#allocation3 + $0x420] sm:$0xff] }
  0x1d   :  { %86 = vperm.xlu0 %1417, %v67_v19   ;;  %1386 = vmatpush.msra.mxu2 %v228_v21  ;;  %v238_v54 = vld [vmem:[#allocation3 + $0x128] sm:$0xff]  ;;  %v235_v58 = vld [vmem:[#allocation3 + $0x110] sm:$0xff]  ;;  %v232_v62 = vld [vmem:[#allocation3 + $0xf8] sm:$0xff] }
  0x1e   :  { %91 = vperm.xlu1 %1418, %v68_v20   ;;  %400 = vmatpush.msra.mxu1 %v276_v22  ;;  %v286_v55 = vld [vmem:[#allocation3 + $0x2a8] sm:$0xff]  ;;  %v283_v59 = vld [vmem:[#allocation3 + $0x290] sm:$0xff]  ;;  %v280_v63 = vld [vmem:[#allocation3 + $0x278] sm:$0xff] }
  0x1f   :  { %1402 = vmatpush.msra.mxu3 %v276_v22  ;;  %360 = vmatpush.msra.mxu0 %v225_v23  ;;  %v334_v56 = vld [vmem:[#allocation3 + $0x428] sm:$0xff]  ;;  %v331_v60 = vld [vmem:[#allocation3 + $0x410] sm:$0xff]  ;;  %v328_v0 = vld [vmem:[#allocation3 + $0x3f8] sm:$0xff] }
  0x20   :  { %1387 = vmatpush.msra.mxu2 %v225_v23  ;;  %401 = vmatpush.msra.mxu1 %v273_v24  ;;  %v330_v57 = vld [vmem:[#allocation3 + $0x408] sm:$0xff]  ;;  %v327_v61 = vld [vmem:[#allocation3 + $0x3f0] sm:$0xff]  ;;  %v324_v1 = vld [vmem:[#allocation3 + $0x3d8] sm:$0xff] }
  0x21   :  { %1403 = vmatpush.msra.mxu3 %v273_v24  ;;  %361 = vmatpush.msra.mxu0 %v222_v25  ;;  %v229_v2 = vld [vmem:[#allocation3 + $0xe0] sm:$0xff]  ;;  %v226_v6 = vld [vmem:[#allocation3 + $0xc8] sm:$0xff]  ;;  %v223_v11 = vld [vmem:[#allocation3 + $0xb0] sm:$0xff] }
  0x22   :  { %1388 = vmatpush.msra.mxu2 %v222_v25  ;;  %402 = vmatpush.msra.mxu1 %v270_v26  ;;  %v277_v3 = vld [vmem:[#allocation3 + $0x260] sm:$0xff]  ;;  %v274_v7 = vld [vmem:[#allocation3 + $0x248] sm:$0xff]  ;;  %v271_v12 = vld [vmem:[#allocation3 + $0x230] sm:$0xff] }
  0x23   :  { %1404 = vmatpush.msra.mxu3 %v270_v26  ;;  %362 = vmatpush.msra.mxu0 %v219_v27  ;;  %v325_v4 = vld [vmem:[#allocation3 + $0x3e0] sm:$0xff]  ;;  %v322_v8 = vld [vmem:[#allocation3 + $0x3c8] sm:$0xff]  ;;  %v319_v13 = vld [vmem:[#allocation3 + $0x3b0] sm:$0xff] }
  0x24   :  { %1389 = vmatpush.msra.mxu2 %v219_v27  ;;  %403 = vmatpush.msra.mxu1 %v267_v28  ;;  %v321_v5 = vld [vmem:[#allocation3 + $0x3c0] sm:$0xff]  ;;  %v318_v10 = vld [vmem:[#allocation3 + $0x3a8] sm:$0xff]  ;;  %v315_v14 = vld [vmem:[#allocation3 + $0x390] sm:$0xff] }
  0x25   :  { %1405 = vmatpush.msra.mxu3 %v267_v28  ;;  %363 = vmatpush.msra.mxu0 %v216_v29  ;;  %v1560_v9 = vld [vmem:[%s2140_s1] sm:$0x7]  ;;  %v220_v15 = vld [vmem:[#allocation3 + $0x98] sm:$0xff]  ;;  %v214_v24 = vld [vmem:[#allocation3 + $0x68] sm:$0xff] }
  0x26   :  { %1390 = vmatpush.msra.mxu2 %v216_v29  ;;  %404 = vmatpush.msra.mxu1 %v264_v30  ;;  %v268_v16 = vld [vmem:[#allocation3 + $0x218] sm:$0xff]  ;;  %v217_v19 = vld [vmem:[#allocation3 + $0x80] sm:$0xff]  ;;  %v1568_v25 = vperm.slane %v1560_v9, 0  ;;  %v1571_v26 = vperm.slane %v1560_v9, 1  ;;  %v262_v27 = vld [vmem:[#allocation3 + $0x1e8] sm:$0xff] }
  0x27   :  { %1406 = vmatpush.msra.mxu3 %v264_v30  ;;  %364 = vmatpush.msra.mxu0 %v213_v31  ;;  %v316_v17 = vld [vmem:[#allocation3 + $0x398] sm:$0xff]  ;;  %v265_v20 = vld [vmem:[#allocation3 + $0x200] sm:$0xff]  ;;  %v310_v28 = vld [vmem:[#allocation3 + $0x368] sm:$0xff] }
  0x28   :  { %1391 = vmatpush.msra.mxu2 %v213_v31  ;;  %405 = vmatpush.msra.mxu1 %v261_v32  ;;  %v312_v18 = vld [vmem:[#allocation3 + $0x378] sm:$0xff]  ;;  %v313_v21 = vld [vmem:[#allocation3 + $0x380] sm:$0xff] }
  0x29   :  { %1407 = vmatpush.msra.mxu3 %v261_v32  ;;  %365 = vmatpush.msra.mxu0 %v210_v33  ;;  %v1565_v22 = vld [vmem:[%s2141_s2] sm:$0x7] }
  0x2a   :  { %1392 = vmatpush.msra.mxu2 %v210_v33  ;;  %406 = vmatpush.msra.mxu1 %v258_v34  ;;  %v309_v23 = vld [vmem:[#allocation3 + $0x360] sm:$0xff]  ;;  %v1574_v29 = vperm.slane %v1565_v22, 0  ;;  %v1577_v30 = vperm.slane %v1565_v22, 1 }
  0x2b   :  { %1408 = vmatpush.msra.mxu3 %v258_v34  ;;  %366 = vmatpush.msra.mxu0 %v207_v35  ;;  %v306_v34 = vld [vmem:[#allocation3 + $0x348] sm:$0xff] }
  0x2c   :  { %1393 = vmatpush.msra.mxu2 %v207_v35  ;;  %407 = vmatpush.msra.mxu1 %v255_v36  ;;  %v211_v35 = vld [vmem:[#allocation3 + $0x50] sm:$0xff] }
  0x2d   :  { %1409 = vmatpush.msra.mxu3 %v255_v36  ;;  %367 = vmatpush.msra.mxu0 %v204_v37  ;;  %v259_v36 = vld [vmem:[#allocation3 + $0x1d0] sm:$0xff] }
  0x2e   :  { %1394 = vmatpush.msra.mxu2 %v204_v37  ;;  %408 = vmatpush.msra.mxu1 %v252_v38 }
  0x2f   :  { %1410 = vmatpush.msra.mxu3 %v252_v38  ;;  %368 = vmatpush.msra.mxu0 %v201_v39 }
  0x30   :  { %1395 = vmatpush.msra.mxu2 %v201_v39  ;;  %409 = vmatpush.msra.mxu1 %v249_v40 }
  0x31   :  { %1411 = vmatpush.msra.mxu3 %v249_v40  ;;  %517 = vmatpush.msrb.mxu0 %v295_v43  ;;  %v307_v40 = vld [vmem:[#allocation3 + $0x350] sm:$0xff] }
  0x32   :  { %435 = vmatpush.msrb.mxu2 %v342_v41  ;;  %558 = vmatpush.msrb.mxu1 %v343_v44  ;;  %v303_v41 = vld [vmem:[#allocation3 + $0x330] sm:$0xff] }
  0x33   :  { %476 = vmatpush.msrb.mxu3 %v247_v42  ;;  %518 = vmatpush.msrb.mxu0 %v292_v47  ;;  %v208_v42 = vld [vmem:[#allocation3 + $0x38] sm:$0xff] }
  0x34   :  { %436 = vmatpush.msrb.mxu2 %v339_v45  ;;  %559 = vmatpush.msrb.mxu1 %v340_v48  ;;  %v256_v45 = vld [vmem:[#allocation3 + $0x1b8] sm:$0xff] }
  0x35   :  { %477 = vmatpush.msrb.mxu3 %v244_v46  ;;  %519 = vmatpush.msrb.mxu0 %v289_v51  ;;  %v304_v46 = vld [vmem:[#allocation3 + $0x338] sm:$0xff]  ;;  %v205_v51 = vld [vmem:[#allocation3 + $0x20] sm:$0xff] }
  0x36   :  { %437 = vmatpush.msrb.mxu2 %v336_v49  ;;  %560 = vmatpush.msrb.mxu1 %v337_v52  ;;  %v300_v47 = vld [vmem:[#allocation3 + $0x318] sm:$0xff]  ;;  %v253_v52 = vld [vmem:[#allocation3 + $0x1a0] sm:$0xff] }
  0x37   :  { %478 = vmatpush.msrb.mxu3 %v241_v50  ;;  %520 = vmatpush.msrb.mxu0 %v286_v55 }
  0x38   :  { %438 = vmatpush.msrb.mxu2 %v333_v53  ;;  %561 = vmatpush.msrb.mxu1 %v334_v56 }
  0x39   :  { %479 = vmatpush.msrb.mxu3 %v238_v54  ;;  %521 = vmatpush.msrb.mxu0 %v283_v59  ;;  %v301_v59 = vld [vmem:[#allocation3 + $0x320] sm:$0xff] }
  0x3a   :  { %439 = vmatpush.msrb.mxu2 %v330_v57  ;;  %562 = vmatpush.msrb.mxu1 %v331_v60 }
  0x3b   :  { %480 = vmatpush.msrb.mxu3 %v235_v58  ;;  %522 = vmatpush.msrb.mxu0 %v280_v63 }
  0x3c   :  { %440 = vmatpush.msrb.mxu2 %v327_v61  ;;  %563 = vmatpush.msrb.mxu1 %v328_v0  ;;  %v297_v61 = vld [vmem:[#allocation3 + $0x300] sm:$0xff] }
  0x3d   :  { %481 = vmatpush.msrb.mxu3 %v232_v62  ;;  %523 = vmatpush.msrb.mxu0 %v277_v3  ;;  %v202_v62 = vld [vmem:[#allocation3 + $0x8] sm:$0xff] }
  0x3e   :  { %441 = vmatpush.msrb.mxu2 %v324_v1  ;;  %564 = vmatpush.msrb.mxu1 %v325_v4  ;;  %v298_v3 = vld [vmem:[#allocation3 + $0x308] sm:$0xff] }
  0x3f   :  { %482 = vmatpush.msrb.mxu3 %v229_v2  ;;  %524 = vmatpush.msrb.mxu0 %v274_v7  ;;  %v250_v2 = vld [vmem:[#allocation3 + $0x188] sm:$0xff]  ;;  %v296_v7 = vld [vmem:[#allocation3 + $0x2f8] sm:$0xff] }
  0x40   :  { %442 = vmatpush.msrb.mxu2 %v321_v5  ;;  %565 = vmatpush.msrb.mxu1 %v322_v8 }
  0x41   :  { %483 = vmatpush.msrb.mxu3 %v226_v6  ;;  %525 = vmatpush.msrb.mxu0 %v271_v12  ;;  %v248_v6 = vld [vmem:[#allocation3 + $0x178] sm:$0xff]  ;;  %v245_v12 = vld [vmem:[#allocation3 + $0x160] sm:$0xff] }
  0x42   :  { %443 = vmatpush.msrb.mxu2 %v318_v10  ;;  %566 = vmatpush.msrb.mxu1 %v319_v13  ;;  %v293_v13 = vld [vmem:[#allocation3 + $0x2e0] sm:$0xff] }
  0x43   :  { %484 = vmatpush.msrb.mxu3 %v223_v11  ;;  %526 = vmatpush.msrb.mxu0 %v268_v16 }
  0x44   :  { %444 = vmatpush.msrb.mxu2 %v315_v14  ;;  %567 = vmatpush.msrb.mxu1 %v316_v17 }
  0x45   :  { %485 = vmatpush.msrb.mxu3 %v220_v15  ;;  %527 = vmatpush.msrb.mxu0 %v265_v20  ;;  %v242_v20 = vld [vmem:[#allocation3 + $0x148] sm:$0xff] }
  0x46   :  { %445 = vmatpush.msrb.mxu2 %v312_v18  ;;  %568 = vmatpush.msrb.mxu1 %v313_v21  ;;  %v290_v21 = vld [vmem:[#allocation3 + $0x2c8] sm:$0xff] }
  0x47   :  { %486 = vmatpush.msrb.mxu3 %v217_v19  ;;  %528 = vmatpush.msrb.mxu0 %v262_v27 }
  0x48   :  { %446 = vmatpush.msrb.mxu2 %v309_v23  ;;  %569 = vmatpush.msrb.mxu1 %v310_v28  ;;  %v344_v23 = vld [vmem:[#allocation3 + $0x478] sm:$0xff] }
  0x49   :  { %487 = vmatpush.msrb.mxu3 %v214_v24  ;;  %529 = vmatpush.msrb.mxu0 %v259_v36  ;;  %v287_v36 = vld [vmem:[#allocation3 + $0x2b0] sm:$0xff] }
  0x4a   :  { %447 = vmatpush.msrb.mxu2 %v306_v34  ;;  %570 = vmatpush.msrb.mxu1 %v307_v40 }
  0x4b   :  { %488 = vmatpush.msrb.mxu3 %v211_v35  ;;  %530 = vmatpush.msrb.mxu0 %v256_v45  ;;  %v239_v35 = vld [vmem:[#allocation3 + $0x130] sm:$0xff] }
  0x4c   :  { %448 = vmatpush.msrb.mxu2 %v303_v41  ;;  %571 = vmatpush.msrb.mxu1 %v304_v46 }
  0x4d   :  { %489 = vmatpush.msrb.mxu3 %v208_v42  ;;  %531 = vmatpush.msrb.mxu0 %v253_v52 }
  0x4e   :  { %449 = vmatpush.msrb.mxu2 %v300_v47  ;;  %572 = vmatpush.msrb.mxu1 %v301_v59  ;;  %v335_v59 = vld [vmem:[#allocation3 + $0x430] sm:$0xff] }
  0x4f   :  { %490 = vmatpush.msrb.mxu3 %v205_v51  ;;  %532 = vmatpush.msrb.mxu0 %v250_v2  ;;  %v338_v51 = vld [vmem:[#allocation3 + $0x448] sm:$0xff] }
  0x50   :  { %450 = vmatpush.msrb.mxu2 %v297_v61  ;;  %573 = vmatpush.msrb.mxu1 %v298_v3 }
  0x51   :  { %491 = vmatpush.msrb.mxu3 %v202_v62  ;;  %v1680_v62 = vperm.slane %v1560_v9, 2  ;;  %v1695_v9 = vperm.slane %v1565_v22, 2 }
  0x68   :  { %v1579_v31 = vpop.permute.xlu2 %81 }
  0x69   :  { %v124_v44 = vmul.f32 %v1568_v25, %v1579_v31  ;;  %v125_v54 = vmul.f32 %v1571_v26, %v1579_v31  ;;  %v126_v22 = vmul.f32 %v1680_v62, %v1579_v31  ;;  %v323_v31 = vld [vmem:[#allocation3 + $0x3d0] sm:$0xff] }
  0x6b   :  { %v156_v60 = vadd.f32 %v1574_v29, %v124_v44  ;;  %v157_v1 = vadd.f32 %v1577_v30, %v125_v54  ;;  %v281_v54 = vld [vmem:[#allocation3 + $0x280] sm:$0xff] }
  0x6d   :  { %v1623_v8 = vmax.f32 %v156_v60, 0.0  ;;  %v1627_v14 = vmax.f32 %v157_v1, 0.0 }
  0x70   :  { %v1647_v28 = vpop.permute.xlu2 %111 }
  0x71   :  { %v142_v42 = vmul.f32 %v1568_v25, %v1647_v28  ;;  %v143_v47 = vmul.f32 %v1571_v26, %v1647_v28 }
  0x73   :  { %v175_v61 = vadd.f32 %v1577_v30, %v143_v47  ;;  %v260_v47 = vld [vmem:[#allocation3 + $0x1d8] sm:$0xff] }
  0x7f   :  { %v1581_v32 = vpop.permute.xlu0 %96 }
  0x80   :  { %v1583_v33 = vpop.permute.xlu1 %76  ;;  %v133_v37 = vmul.f32 %v1568_v25, %v1581_v32  ;;  %v134_v38 = vmul.f32 %v1571_v26, %v1581_v32 }
  0x81   :  { %v121_v39 = vmul.f32 %v1568_v25, %v1583_v33  ;;  %v122_v43 = vmul.f32 %v1571_v26, %v1583_v33  ;;  %v123_v1 = vmul.f32 %v1680_v62, %v1583_v33  ;;  %v278_v33 = vld [vmem:[#allocation3 + $0x268] sm:$0xff] }
  0x82   :  { %v165_v49 = vadd.f32 %v1574_v29, %v133_v37  ;;  %v166_v50 = vadd.f32 %v1577_v30, %v134_v38  ;;  %v341_v37 = vld [vmem:[#allocation3 + $0x460] sm:$0xff] }
  0x83   :  { %v153_v48 = vadd.f32 %v1574_v29, %v121_v39  ;;  %v154_v53 = vadd.f32 %v1577_v30, %v122_v43 }
  0x84   :  { %v1603_v56 = vmax.f32 %v165_v49, 0.0  ;;  %v1605_v57 = vmax.f32 %v166_v50, 0.0  ;;  %v284_v50 = vld [vmem:[#allocation3 + $0x298] sm:$0xff] }
  0x85   :  { %v1601_v55 = vmax.f32 %v153_v48, 0.0  ;;  %v1607_v58 = vmax.f32 %v154_v53, 0.0  ;;  %v174_v53 = vadd.f32 %v1574_v29, %v142_v42 }
  0x86   :  { %381 = vmatmul.f32.vlgmr.msra.gmra.mxu2 %v1603_v56  ;;  %422 = vmatmul.f32.vlgmr.msra.gmra.mxu3 %v1605_v57 }
  0x87   :  { %369 = vmatmul.f32.vlgmr.msra.gmra.mxu0 %v1601_v55  ;;  %410 = vmatmul.f32.vlgmr.msra.gmra.mxu1 %v1607_v58  ;;  %v1614_v63 = vpop.permute.xlu0 %101  ;;  %v1686_v2 = vmax.f32 %v174_v53, 0.0 }
  0x88   :  { %v1616_v0 = vpop.permute.xlu1 %106  ;;  %v136_v4 = vmul.f32 %v1568_v25, %v1614_v63  ;;  %v137_v5 = vmul.f32 %v1571_v26, %v1614_v63  ;;  %599 = vmatpush.msra.mxu2 %v248_v6  ;;  %640 = vmatpush.msra.mxu3 %v296_v7  ;;  %v155_v6 = vadd.f32 %v1695_v9, %v123_v1  ;;  %v227_v7 = vld [vmem:[#allocation3 + $0xd0] sm:$0xff] }
  0x89   :  { %v139_v15 = vmul.f32 %v1568_v25, %v1616_v0  ;;  %v140_v18 = vmul.f32 %v1571_v26, %v1616_v0  ;;  %681 = vmatpush.msra.mxu0 %v344_v23  ;;  %v269_v23 = vld [vmem:[#allocation3 + $0x220] sm:$0xff]  ;;  %v203_v1 = vld [vmem:[#allocation3 + $0x10] sm:$0xff] }
  0x8a   :  { %v168_v10 = vadd.f32 %v1574_v29, %v136_v4  ;;  %v169_v11 = vadd.f32 %v1577_v30, %v137_v5  ;;  %600 = vmatpush.msra.mxu2 %v245_v12  ;;  %641 = vmatpush.msra.mxu3 %v293_v13  ;;  %v1690_v4 = vmax.f32 %v175_v61, 0.0  ;;  %v332_v5 = vld [vmem:[#allocation3 + $0x418] sm:$0xff]  ;;  %v1702_v12 = vmax.f32 %v155_v6, 0.0  ;;  %v305_v61 = vld [vmem:[#allocation3 + $0x340] sm:$0xff]  ;;  %v299_v6 = vld [vmem:[#allocation3 + $0x310] sm:$0xff] }
  0x8b   :  { %v171_v34 = vadd.f32 %v1574_v29, %v139_v15  ;;  %v172_v39 = vadd.f32 %v1577_v30, %v140_v18  ;;  %682 = vmatpush.msra.mxu0 %v341_v37  ;;  %v224_v13 = vld [vmem:[#allocation3 + $0xb8] sm:$0xff]  ;;  %v326_v18 = vld [vmem:[#allocation3 + $0x3e8] sm:$0xff] }
  0x8c   :  { %v1631_v16 = vmax.f32 %v168_v10, 0.0  ;;  %v1633_v17 = vmax.f32 %v169_v11, 0.0  ;;  %601 = vmatpush.msra.mxu2 %v242_v20  ;;  %642 = vmatpush.msra.mxu3 %v290_v21  ;;  %v275_v10 = vld [vmem:[#allocation3 + $0x250] sm:$0xff]  ;;  %v329_v11 = vld [vmem:[#allocation3 + $0x400] sm:$0xff]  ;;  %v272_v15 = vld [vmem:[#allocation3 + $0x238] sm:$0xff]  ;;  %v158_v20 = vadd.f32 %v1695_v9, %v126_v22  ;;  %v144_v22 = vmul.f32 %v1680_v62, %v1647_v28 }
  0x8d   :  { %v1661_v45 = vmax.f32 %v171_v34, 0.0  ;;  %v1669_v49 = vmax.f32 %v172_v39, 0.0  ;;  %683 = vmatpush.msra.mxu0 %v338_v51  ;;  %v221_v21 = vld [vmem:[#allocation3 + $0xa0] sm:$0xff]  ;;  %v218_v34 = vld [vmem:[#allocation3 + $0x88] sm:$0xff]  ;;  %v215_v39 = vld [vmem:[#allocation3 + $0x70] sm:$0xff] }
  0x8e   :  { %384 = vmatmul.f32.gmra.mxu2 %v1631_v16  ;;  %425 = vmatmul.f32.gmra.mxu3 %v1633_v17  ;;  %v257_v51 = vld [vmem:[#allocation3 + $0x1c0] sm:$0xff]  ;;  %v788_v28 = vld [vmem:[#allocation5 + $0x150] sm:$0xff] }
  0x8f   :  { %372 = vmatmul.f32.gmra.mxu0 %v1623_v8  ;;  %413 = vmatmul.f32.gmra.mxu1 %v1627_v14  ;;  %v1641_v19 = vpop.permute.xlu0 %86 }
  0x90   :  { %v127_v24 = vmul.f32 %v1568_v25, %v1641_v19  ;;  %v128_v27 = vmul.f32 %v1571_v26, %v1641_v19  ;;  %v1650_v38 = vpop.permute.xlu1 %91  ;;  %602 = vmatpush.msra.mxu2 %v239_v35  ;;  %643 = vmatpush.msra.mxu3 %v287_v36  ;;  %v266_v35 = vld [vmem:[#allocation3 + $0x208] sm:$0xff]  ;;  %v320_v36 = vld [vmem:[#allocation3 + $0x3b8] sm:$0xff] }
  0x91   :  { %v130_v43 = vmul.f32 %v1568_v25, %v1650_v38  ;;  %v131_v48 = vmul.f32 %v1571_v26, %v1650_v38  ;;  %v236_v25 = vld [vmem:[#allocation3 + $0x118] sm:$0xff]  ;;  %v233_v26 = vld [vmem:[#allocation3 + $0x100] sm:$0xff]  ;;  %684 = vmatpush.msra.mxu0 %v335_v59  ;;  %v254_v59 = vld [vmem:[#allocation3 + $0x1a8] sm:$0xff] }
  0x92   :  { %v159_v40 = vadd.f32 %v1574_v29, %v127_v24  ;;  %v160_v41 = vadd.f32 %v1577_v30, %v128_v27  ;;  %603 = vmatpush.msra.mxu2 %v236_v25  ;;  %644 = vmatpush.msra.mxu3 %v284_v50  ;;  %v129_v24 = vmul.f32 %v1680_v62, %v1641_v19  ;;  %v1711_v27 = vmax.f32 %v158_v20, 0.0  ;;  %v317_v19 = vld [vmem:[#allocation3 + $0x3a0] sm:$0xff]  ;;  %v779_v20 = vld [vmem:[#allocation5 + $0x108] sm:$0xff] }
  0x93   :  { %v162_v52 = vadd.f32 %v1574_v29, %v130_v43  ;;  %v163_v60 = vadd.f32 %v1577_v30, %v131_v48  ;;  %v230_v30 = vld [vmem:[#allocation3 + $0xe8] sm:$0xff]  ;;  %685 = vmatpush.msra.mxu0 %v332_v5  ;;  %v212_v43 = vld [vmem:[#allocation3 + $0x58] sm:$0xff]  ;;  %v209_v50 = vld [vmem:[#allocation3 + $0x40] sm:$0xff] }
  0x94   :  { %v1659_v44 = vmax.f32 %v159_v40, 0.0  ;;  %v1663_v46 = vmax.f32 %v160_v41, 0.0  ;;  %604 = vmatpush.msra.mxu2 %v233_v26  ;;  %645 = vmatpush.msra.mxu3 %v281_v54  ;;  %v161_v37 = vadd.f32 %v1695_v9, %v129_v24  ;;  %v263_v40 = vld [vmem:[#allocation3 + $0x1f0] sm:$0xff]  ;;  %v132_v41 = vmul.f32 %v1680_v62, %v1650_v38  ;;  %v314_v48 = vld [vmem:[#allocation3 + $0x388] sm:$0xff]  ;;  %v308_v54 = vld [vmem:[#allocation3 + $0x358] sm:$0xff] }
  0x95   :  { %v1684_v29 = vmax.f32 %v162_v52, 0.0  ;;  %v1688_v3 = vmax.f32 %v163_v60, 0.0  ;;  %686 = vmatpush.msra.mxu0 %v329_v11  ;;  %v311_v38 = vld [vmem:[#allocation3 + $0x370] sm:$0xff]  ;;  %v135_v52 = vmul.f32 %v1680_v62, %v1581_v32  ;;  %v206_v26 = vld [vmem:[#allocation3 + $0x28] sm:$0xff] }
  0x96   :  { %387 = vmatmul.f32.gmra.mxu2 %v1661_v45  ;;  %428 = vmatmul.f32.gmra.mxu3 %v1669_v49  ;;  %v1720_v42 = vmax.f32 %v161_v37, 0.0  ;;  %v164_v25 = vadd.f32 %v1695_v9, %v132_v41  ;;  %v302_v32 = vld [vmem:[#allocation3 + $0x328] sm:$0xff]  ;;  %v821_v41 = vld [vmem:[#allocation5 + $0x258] sm:$0xff] }
  0x97   :  { %375 = vmatmul.f32.gmra.mxu0 %v1659_v44  ;;  %416 = vmatmul.f32.gmra.mxu1 %v1663_v46  ;;  %v167_v60 = vadd.f32 %v1695_v9, %v135_v52  ;;  %v783_v24 = vld [vmem:[#allocation5 + $0x128] sm:$0xff] }
  0x98   :  { %605 = vmatpush.msra.mxu2 %v230_v30  ;;  %646 = vmatpush.msra.mxu3 %v278_v33  ;;  %v1729_v53 = vmax.f32 %v164_v25, 0.0  ;;  %v251_v30 = vld [vmem:[#allocation3 + $0x190] sm:$0xff]  ;;  %v138_v33 = vmul.f32 %v1680_v62, %v1614_v63  ;;  %v827_v37 = vld [vmem:[#allocation5 + $0x288] sm:$0xff]  ;;  %v765_v25 = vld [vmem:[#allocation5 + $0x98] sm:$0xff] }
  0x99   :  { %687 = vmatpush.msra.mxu0 %v326_v18  ;;  %v1738_v5 = vmax.f32 %v167_v60, 0.0  ;;  %v755_v52 = vld [vmem:[#allocation5 + $0x48] sm:$0xff] }
  0x9a   :  { %606 = vmatpush.msra.mxu2 %v227_v7  ;;  %647 = vmatpush.msra.mxu3 %v275_v10  ;;  %v170_v7 = vadd.f32 %v1695_v9, %v138_v33  ;;  %v141_v10 = vmul.f32 %v1680_v62, %v1616_v0  ;;  %v791_v0 = vld [vmem:[#allocation5 + $0x168] sm:$0xff]  ;;  %v785_v62 = vld [vmem:[#allocation5 + $0x138] sm:$0xff] }
  0x9b   :  { %688 = vmatpush.msra.mxu0 %v323_v31  ;;  %898 = vmatpush.msra.mxu1 %v791_v0  ;;  %v786_v31 = vld [vmem:[#allocation5 + $0x140] sm:$0xff]  ;;  %v803_v33 = vld [vmem:[#allocation5 + $0x1c8] sm:$0xff] }
  0x9c   :  { %607 = vmatpush.msra.mxu2 %v224_v13  ;;  %648 = vmatpush.msra.mxu3 %v272_v15  ;;  %v1747_v11 = vmax.f32 %v170_v7, 0.0  ;;  %v173_v63 = vadd.f32 %v1695_v9, %v141_v10  ;;  %v176_v15 = vadd.f32 %v1695_v9, %v144_v22  ;;  %v782_v9 = vld [vmem:[#allocation5 + $0x120] sm:$0xff]  ;;  %v800_v7 = vld [vmem:[#allocation5 + $0x1b0] sm:$0xff] }
  0x9d   :  { %689 = vmatpush.msra.mxu0 %v320_v36  ;;  %899 = vmatpush.msra.mxu1 %v788_v28  ;;  %v777_v36 = vld [vmem:[#allocation5 + $0xf8] sm:$0xff]  ;;  %v884_v28 = vld [vmem:[#allocation5 + $0x450] sm:$0xff] }
  0x9e   :  { %390 = vmatmul.f32.gmra.mxu2 %v1686_v2  ;;  %431 = vmatmul.f32.gmra.mxu3 %v1690_v4  ;;  %v1756_v13 = vmax.f32 %v173_v63, 0.0  ;;  %v1763_v18 = vmax.f32 %v176_v15, 0.0  ;;  %v747_v63 = vld [vmem:[#allocation5 + $0x8] sm:$0xff] }
  0x9f   :  { %378 = vmatmul.f32.gmra.mxu0 %v1684_v29  ;;  %419 = vmatmul.f32.gmra.mxu1 %v1688_v3  ;;  %v887_v15 = vld [vmem:[#allocation5 + $0x468] sm:$0xff] }
  0xa0   :  { %608 = vmatpush.msra.mxu2 %v221_v21  ;;  %649 = vmatpush.msra.mxu3 %v269_v23  ;;  %v792_v21 = vld [vmem:[#allocation5 + $0x170] sm:$0xff] }
  0xa1   :  { %690 = vmatpush.msra.mxu0 %v317_v19  ;;  %900 = vmatpush.msra.mxu1 %v785_v62  ;;  %v776_v23 = vld [vmem:[#allocation5 + $0xf0] sm:$0xff] }
  0xa2   :  { %609 = vmatpush.msra.mxu2 %v218_v34  ;;  %650 = vmatpush.msra.mxu3 %v266_v35  ;;  %v770_v34 = vld [vmem:[#allocation5 + $0xc0] sm:$0xff]  ;;  %v764_v19 = vld [vmem:[#allocation5 + $0x90] sm:$0xff] }
  0xa3   :  { %691 = vmatpush.msra.mxu0 %v314_v48  ;;  %901 = vmatpush.msra.mxu1 %v782_v9  ;;  %v830_v35 = vld [vmem:[#allocation5 + $0x2a0] sm:$0xff] }
  0xa4   :  { %610 = vmatpush.msra.mxu2 %v215_v39  ;;  %651 = vmatpush.msra.mxu3 %v263_v40  ;;  %v824_v39 = vld [vmem:[#allocation5 + $0x270] sm:$0xff]  ;;  %v771_v40 = vld [vmem:[#allocation5 + $0xc8] sm:$0xff] }
  0xa5   :  { %692 = vmatpush.msra.mxu0 %v311_v38  ;;  %902 = vmatpush.msra.mxu1 %v779_v20  ;;  %v812_v38 = vld [vmem:[#allocation5 + $0x210] sm:$0xff] }
  0xa6   :  { %451 = vmatmul.f32.vlgmr.msrb.gmra.mxu2 %v1702_v12  ;;  %492 = vmatmul.f32.vlgmr.msrb.gmra.mxu3 %v1601_v55 }
  0xa7   :  { %533 = vmatmul.f32.vlgmr.msrb.gmra.mxu0 %v1607_v58  ;;  %574 = vmatmul.f32.vlgmr.msrb.gmra.mxu1 %v1702_v12 }
  0xa8   :  { %611 = vmatpush.msra.mxu2 %v212_v43  ;;  %652 = vmatpush.msra.mxu3 %v260_v47  ;;  %v818_v43 = vld [vmem:[#allocation5 + $0x240] sm:$0xff] }
  0xa9   :  { %693 = vmatpush.msra.mxu0 %v308_v54  ;;  %903 = vmatpush.msra.mxu1 %v776_v23  ;;  %v809_v54 = vld [vmem:[#allocation5 + $0x1f8] sm:$0xff]  ;;  %v840_v23 = vld [vmem:[#allocation5 + $0x2f0] sm:$0xff] }
  0xaa   :  { %612 = vmatpush.msra.mxu2 %v209_v50  ;;  %653 = vmatpush.msra.mxu3 %v257_v51  ;;  %v758_v50 = vld [vmem:[#allocation5 + $0x60] sm:$0xff] }
  0xab   :  { %694 = vmatpush.msra.mxu0 %v305_v61  ;;  %v762_v51 = vld [vmem:[#allocation5 + $0x80] sm:$0xff] }
  0xac   :  { %613 = vmatpush.msra.mxu2 %v206_v26  ;;  %654 = vmatpush.msra.mxu3 %v254_v59  ;;  %v752_v59 = vld [vmem:[#allocation5 + $0x30] sm:$0xff] }
  0xad   :  { %695 = vmatpush.msra.mxu0 %v302_v32  ;;  %v753_v32 = vld [vmem:[#allocation5 + $0x38] sm:$0xff] }
  0xae   :  { %454 = vmatmul.f32.gmra.mxu2 %v1711_v27  ;;  %495 = vmatmul.f32.gmra.mxu3 %v1623_v8 }
  0xaf   :  { %536 = vmatmul.f32.gmra.mxu0 %v1627_v14  ;;  %577 = vmatmul.f32.gmra.mxu1 %v1711_v27 }
  0xb0   :  { %614 = vmatpush.msra.mxu2 %v203_v1  ;;  %655 = vmatpush.msra.mxu3 %v251_v30  ;;  %v806_v1 = vld [vmem:[#allocation5 + $0x1e0] sm:$0xff]  ;;  %v749_v30 = vld [vmem:[#allocation5 + $0x18] sm:$0xff] }
  0xb1   :  { %696 = vmatpush.msra.mxu0 %v299_v6  ;;  %v746_v6 = vld [vmem:[#allocation5] sm:$0xff] }
  0xb2   :  { %980 = vmatpush.msrb.mxu3 %v887_v15  ;;  %v882_v15 = vld [vmem:[#allocation5 + $0x440] sm:$0xff] }
  0xb3   :  { %1021 = vmatpush.msrb.mxu0 %v792_v21 }
  0xb4   :  { %981 = vmatpush.msrb.mxu3 %v884_v28  ;;  %v819_v28 = vld [vmem:[#allocation5 + $0x248] sm:$0xff] }
  0xb6   :  { %457 = vmatmul.f32.gmra.mxu2 %v1720_v42  ;;  %498 = vmatmul.f32.gmra.mxu3 %v1659_v44 }
  0xb7   :  { %539 = vmatmul.f32.gmra.mxu0 %v1663_v46  ;;  %580 = vmatmul.f32.gmra.mxu1 %v1720_v42 }
  0xbe   :  { %460 = vmatmul.f32.gmra.mxu2 %v1729_v53  ;;  %501 = vmatmul.f32.gmra.mxu3 %v1684_v29 }
  0xbf   :  { %542 = vmatmul.f32.gmra.mxu0 %v1688_v3  ;;  %583 = vmatmul.f32.gmra.mxu1 %v1729_v53 }
  0xc6   :  { %463 = vmatmul.f32.gmra.mxu2 %v1738_v5  ;;  %504 = vmatmul.f32.gmra.mxu3 %v1603_v56 }
  0xc7   :  { %545 = vmatmul.f32.gmra.mxu0 %v1605_v57  ;;  %586 = vmatmul.f32.gmra.mxu1 %v1738_v5 }
  0xce   :  { %466 = vmatmul.f32.gmra.mxu2 %v1747_v11  ;;  %507 = vmatmul.f32.gmra.mxu3 %v1631_v16 }
  0xcf   :  { %548 = vmatmul.f32.gmra.mxu0 %v1633_v17  ;;  %589 = vmatmul.f32.gmra.mxu1 %v1747_v11 }
  0xd6   :  { %469 = vmatmul.f32.gmra.mxu2 %v1756_v13  ;;  %510 = vmatmul.f32.gmra.mxu3 %v1661_v45 }
  0xd7   :  { %551 = vmatmul.f32.gmra.mxu0 %v1669_v49  ;;  %592 = vmatmul.f32.gmra.mxu1 %v1756_v13 }
  0xde   :  { %472 = vmatmul.f32.gmra.mxu2 %v1763_v18  ;;  %513 = vmatmul.f32.gmra.mxu3 %v1686_v2 }
  0xdf   :  { %554 = vmatmul.f32.gmra.mxu0 %v1690_v4  ;;  %595 = vmatmul.f32.gmra.mxu1 %v1763_v18 }
  0xe6   :  { %615 = vmatmul.f32.vlgmr.msra.gmra.mxu2 %v1601_v55  ;;  %656 = vmatmul.f32.vlgmr.msra.gmra.mxu3 %v1607_v58  ;;  %v789_v55 = vld [vmem:[#allocation5 + $0x158] sm:$0xff]  ;;  %v836_v58 = vld [vmem:[#allocation5 + $0x2d0] sm:$0xff] }
  0xe7   :  { %697 = vmatmul.f32.vlgmr.msra.gmra.mxu0 %v1702_v12  ;;  %v839_v12 = vld [vmem:[#allocation5 + $0x2e8] sm:$0xff] }
  0xe8   :  { %1022 = vmatpush.msrb.mxu0 %v789_v55  ;;  %939 = vmatpush.msrb.mxu2 %v839_v12  ;;  %v878_v55 = vld [vmem:[#allocation5 + $0x420] sm:$0xff] }
  0xea   :  { %1023 = vmatpush.msrb.mxu0 %v786_v31  ;;  %940 = vmatpush.msrb.mxu2 %v836_v58 }
  0xec   :  { %1024 = vmatpush.msrb.mxu0 %v783_v24 }
  0xee   :  { %618 = vmatmul.f32.gmra.mxu2 %v1623_v8  ;;  %659 = vmatmul.f32.gmra.mxu3 %v1627_v14  ;;  %v773_v8 = vld [vmem:[#allocation5 + $0xd8] sm:$0xff] }
  0xef   :  { %700 = vmatmul.f32.gmra.mxu0 %v1711_v27  ;;  %904 = vmatpush.msra.mxu1 %v773_v8  ;;  %v833_v14 = vld [vmem:[#allocation5 + $0x2b8] sm:$0xff]  ;;  %v780_v27 = vld [vmem:[#allocation5 + $0x110] sm:$0xff]  ;;  %v875_v8 = vld [vmem:[#allocation5 + $0x408] sm:$0xff] }
  0xf0   :  { %941 = vmatpush.msrb.mxu2 %v833_v14  ;;  %1025 = vmatpush.msrb.mxu0 %v780_v27  ;;  %v834_v14 = vld [vmem:[#allocation5 + $0x2c0] sm:$0xff]  ;;  %v831_v27 = vld [vmem:[#allocation5 + $0x2a8] sm:$0xff] }
  0xf1   :  { %905 = vmatpush.msra.mxu1 %v770_v34 }
  0xf2   :  { %942 = vmatpush.msrb.mxu2 %v830_v35  ;;  %1026 = vmatpush.msrb.mxu0 %v777_v36 }
  0xf4   :  { %943 = vmatpush.msrb.mxu2 %v827_v37 }
  0xf6   :  { %621 = vmatmul.f32.gmra.mxu2 %v1659_v44  ;;  %662 = vmatmul.f32.gmra.mxu3 %v1663_v46  ;;  %v774_v44 = vld [vmem:[#allocation5 + $0xe0] sm:$0xff]  ;;  %v767_v46 = vld [vmem:[#allocation5 + $0xa8] sm:$0xff] }
  0xf7   :  { %703 = vmatmul.f32.gmra.mxu0 %v1720_v42  ;;  %906 = vmatpush.msra.mxu1 %v767_v46  ;;  %v768_v42 = vld [vmem:[#allocation5 + $0xb0] sm:$0xff] }
  0xf8   :  { %1027 = vmatpush.msrb.mxu0 %v774_v44  ;;  %944 = vmatpush.msrb.mxu2 %v824_v39 }
  0xf9   :  { %907 = vmatpush.msra.mxu1 %v764_v19 }
  0xfa   :  { %1028 = vmatpush.msrb.mxu0 %v771_v40  ;;  %945 = vmatpush.msrb.mxu2 %v821_v41 }
  0xfc   :  { %1029 = vmatpush.msrb.mxu0 %v768_v42  ;;  %946 = vmatpush.msrb.mxu2 %v818_v43  ;;  %v869_v43 = vld [vmem:[#allocation5 + $0x3d8] sm:$0xff] }
  0xfe   :  { %624 = vmatmul.f32.gmra.mxu2 %v1684_v29  ;;  %665 = vmatmul.f32.gmra.mxu3 %v1688_v3  ;;  %v761_v29 = vld [vmem:[#allocation5 + $0x78] sm:$0xff]  ;;  %v815_v3 = vld [vmem:[#allocation5 + $0x228] sm:$0xff] }
  0xff   :  { %706 = vmatmul.f32.gmra.mxu0 %v1729_v53  ;;  %908 = vmatpush.msra.mxu1 %v761_v29  ;;  %v759_v53 = vld [vmem:[#allocation5 + $0x68] sm:$0xff]  ;;  %v866_v29 = vld [vmem:[#allocation5 + $0x3c0] sm:$0xff] }
 0x100   :  { %1030 = vmatpush.msrb.mxu0 %v765_v25  ;;  %947 = vmatpush.msrb.mxu2 %v815_v3  ;;  %v825_v25 = vld [vmem:[#allocation5 + $0x278] sm:$0xff] }
 0x101   :  { %909 = vmatpush.msra.mxu1 %v758_v50 }
 0x102   :  { %1031 = vmatpush.msrb.mxu0 %v762_v51  ;;  %948 = vmatpush.msrb.mxu2 %v812_v38 }
 0x103   :  { %910 = vmatpush.msra.mxu1 %v755_v52  ;;  %v838_v52 = vld [vmem:[#allocation5 + $0x2e0] sm:$0xff] }
 0x104   :  { %v1781_v47 = vpop.f32.mrf.mxu0  ;;  %v1783_v48 = vpop.f32.mrf.mxu1  ;;  %1032 = vmatpush.msrb.mxu0 %v759_v53  ;;  %949 = vmatpush.msrb.mxu2 %v809_v54 }
 0x105   :  { %911 = vmatpush.msra.mxu1 %v752_v59 }
 0x106   :  { %627 = vmatmul.f32.gmra.mxu2 %v1603_v56  ;;  %668 = vmatmul.f32.gmra.mxu3 %v1605_v57  ;;  %v756_v56 = vld [vmem:[#allocation5 + $0x50] sm:$0xff] }
 0x107   :  { %709 = vmatmul.f32.gmra.mxu0 %v1738_v5  ;;  %950 = vmatpush.msrb.mxu2 %v806_v1  ;;  %v750_v5 = vld [vmem:[#allocation5 + $0x20] sm:$0xff]  ;;  %v835_v1 = vld [vmem:[#allocation5 + $0x2c8] sm:$0xff] }
 0x108   :  { %1033 = vmatpush.msrb.mxu0 %v756_v56  ;;  %912 = vmatpush.msra.mxu1 %v749_v30 }
 0x109   :  { %v1788_v26 = vpop.f32.mrf.mxu2  ;;  %v1790_v60 = vpop.f32.mrf.mxu3  ;;  %951 = vmatpush.msrb.mxu2 %v803_v33 }
 0x10a   :  { %1034 = vmatpush.msrb.mxu0 %v753_v32  ;;  %913 = vmatpush.msra.mxu1 %v746_v6  ;;  %v822_v6 = vld [vmem:[#allocation5 + $0x260] sm:$0xff] }
 0x10b   :  { %952 = vmatpush.msrb.mxu2 %v800_v7  ;;  %v885_v7 = vld [vmem:[#allocation5 + $0x458] sm:$0xff] }
 0x10c   :  { %v1792_v61 = vpop.f32.mrf.mxu0  ;;  %v1794_v57 = vpop.f32.mrf.mxu1  ;;  %1035 = vmatpush.msrb.mxu0 %v750_v5  ;;  %1062 = vmatpush.msrb.mxu1 %v840_v23  ;;  %v863_v5 = vld [vmem:[#allocation5 + $0x3a8] sm:$0xff] }
 0x10e   :  { %630 = vmatmul.f32.gmra.mxu2 %v1631_v16  ;;  %671 = vmatmul.f32.gmra.mxu3 %v1633_v17  ;;  %v797_v16 = vld [vmem:[#allocation5 + $0x198] sm:$0xff]  ;;  %v794_v17 = vld [vmem:[#allocation5 + $0x180] sm:$0xff] }
 0x10f   :  { %712 = vmatmul.f32.gmra.mxu0 %v1747_v11  ;;  %953 = vmatpush.msrb.mxu2 %v797_v16  ;;  %v860_v16 = vld [vmem:[#allocation5 + $0x390] sm:$0xff] }
 0x110   :  { %1036 = vmatpush.msrb.mxu0 %v747_v63  ;;  %v832_v63 = vld [vmem:[#allocation5 + $0x2b0] sm:$0xff] }
 0x111   :  { %v1799_v10 = vpop.f32.mrf.mxu2  ;;  %v1801_v22 = vpop.f32.mrf.mxu3  ;;  %954 = vmatpush.msrb.mxu2 %v794_v17 }
 0x114   :  { %v1803_v0 = vpop.f32.mrf.mxu0  ;;  %v1805_v11 = vpop.f32.mrf.mxu1 }
 0x116   :  { %633 = vmatmul.f32.gmra.mxu2 %v1661_v45  ;;  %674 = vmatmul.f32.gmra.mxu3 %v1669_v49  ;;  %v1821_v45 = vld [vmem:[%s2143_s4] sm:$0x7]  ;;  %v837_v49 = vld [vmem:[#allocation5 + $0x2d8] sm:$0xff] }
 0x117   :  { %715 = vmatmul.f32.gmra.mxu0 %v1756_v13  ;;  %v881_v13 = vld [vmem:[#allocation5 + $0x438] sm:$0xff]  ;;  %v1827_v12 = vperm.slane %v1821_v45, 0  ;;  %1063 = vmatpush.msrb.mxu1 %v837_v49  ;;  %v1836_v34 = vperm.slane %v1821_v45, 1 }
 0x118   :  { %982 = vmatpush.msrb.mxu3 %v881_v13 }
 0x119   :  { %v1810_v62 = vpop.f32.mrf.mxu2  ;;  %v1812_v9 = vpop.f32.mrf.mxu3  ;;  %1064 = vmatpush.msrb.mxu1 %v834_v14  ;;  %v374_v40 = vadd.f32 %v1792_v61, %v1827_v12  ;;  %v888_v61 = vld [vmem:[#allocation5 + $0x470] sm:$0xff] }
 0x11a   :  { %983 = vmatpush.msrb.mxu3 %v878_v55  ;;  %1103 = vmatpush.msra.mxu2 %v888_v61  ;;  %v879_v55 = vld [vmem:[#allocation5 + $0x428] sm:$0xff] }
 0x11b   :  { %1065 = vmatpush.msrb.mxu1 %v831_v27  ;;  %v415_v50 = vadd.f32 %v1794_v57, %v374_v40  ;;  %v377_v57 = vadd.f32 %v1803_v0, %v1827_v12  ;;  %v829_v0 = vld [vmem:[#allocation5 + $0x298] sm:$0xff]  ;;  %v876_v27 = vld [vmem:[#allocation5 + $0x410] sm:$0xff]  ;;  %v854_v40 = vld [vmem:[#allocation5 + $0x360] sm:$0xff] }
 0x11c   :  { %v1814_v20 = vpop.f32.mrf.mxu0  ;;  %v1816_v21 = vpop.f32.mrf.mxu1  ;;  %984 = vmatpush.msrb.mxu3 %v875_v8  ;;  %1104 = vmatpush.msra.mxu2 %v885_v7 }
 0x11d   :  { %v418_v13 = vadd.f32 %v1805_v11, %v377_v57  ;;  %v380_v11 = vadd.f32 %v1814_v20, %v1827_v12  ;;  %v820_v20 = vld [vmem:[#allocation5 + $0x250] sm:$0xff]  ;;  %v807_v57 = vld [vmem:[#allocation5 + $0x1e8] sm:$0xff] }
 0x11e   :  { %636 = vmatmul.f32.gmra.mxu2 %v1686_v2  ;;  %677 = vmatmul.f32.gmra.mxu3 %v1690_v4  ;;  %v371_v2 = vadd.f32 %v1781_v47, %v1827_v12  ;;  %v872_v4 = vld [vmem:[#allocation5 + $0x3f0] sm:$0xff] }
 0x11f   :  { %718 = vmatmul.f32.gmra.mxu0 %v1763_v18  ;;  %985 = vmatpush.msrb.mxu3 %v872_v4  ;;  %v828_v47 = vld [vmem:[#allocation5 + $0x290] sm:$0xff] }
 0x120   :  { %v412_v35 = vadd.f32 %v1783_v48, %v371_v2  ;;  %v841_v48 = vld [vmem:[#allocation5 + $0x2f8] sm:$0xff]  ;;  %1066 = vmatpush.msrb.mxu1 %v828_v47  ;;  %1105 = vmatpush.msra.mxu2 %v882_v15 }
 0x121   :  { %v1829_v31 = vpop.f32.mrf.mxu2  ;;  %v1831_v58 = vpop.f32.mrf.mxu3  ;;  %986 = vmatpush.msrb.mxu3 %v869_v43  ;;  %1185 = vmatpush.msra.mxu0 %v841_v48  ;;  %v421_v43 = vadd.f32 %v1816_v21, %v380_v11  ;;  %v870_v48 = vld [vmem:[#allocation5 + $0x3e0] sm:$0xff]  ;;  %v383_v21 = vadd.f32 %v1788_v26, %v1827_v12  ;;  %v848_v26 = vld [vmem:[#allocation5 + $0x330] sm:$0xff] }
 0x122   :  { %1067 = vmatpush.msrb.mxu1 %v825_v25  ;;  %1106 = vmatpush.msra.mxu2 %v879_v55  ;;  %v817_v25 = vld [vmem:[#allocation5 + $0x238] sm:$0xff] }
 0x123   :  { %987 = vmatpush.msrb.mxu3 %v866_v29  ;;  %1186 = vmatpush.msra.mxu0 %v838_v52  ;;  %v424_v7 = vadd.f32 %v1790_v60, %v383_v21  ;;  %v805_v55 = vld [vmem:[#allocation5 + $0x1d8] sm:$0xff] }
 0x124   :  { %v534_v24 = vpop.f32.mrf.mxu0  ;;  %v575_v18 = vpop.f32.mrf.mxu1  ;;  %1068 = vmatpush.msrb.mxu1 %v822_v6  ;;  %1107 = vmatpush.msra.mxu2 %v876_v27  ;;  %v804_v6 = vld [vmem:[#allocation5 + $0x1d0] sm:$0xff]  ;;  %v798_v27 = vld [vmem:[#allocation5 + $0x1a0] sm:$0xff] }
 0x125   :  { %1187 = vmatpush.msra.mxu0 %v835_v1  ;;  %988 = vmatpush.msrb.mxu3 %v863_v5  ;;  %v851_v1 = vld [vmem:[#allocation5 + $0x348] sm:$0xff] }
 0x126   :  { %1069 = vmatpush.msrb.mxu1 %v819_v28  ;;  %v801_v28 = vld [vmem:[#allocation5 + $0x1b8] sm:$0xff] }
 0x127   :  { %1188 = vmatpush.msra.mxu0 %v832_v63  ;;  %989 = vmatpush.msrb.mxu3 %v860_v16  ;;  %v808_v16 = vld [vmem:[#allocation5 + $0x1f0] sm:$0xff] }
 0x129   :  { %v452_v36 = vpop.f32.mrf.mxu2  ;;  %v493_v44 = vpop.f32.mrf.mxu3  ;;  %1189 = vmatpush.msra.mxu0 %v829_v0  ;;  %v861_v0 = vld [vmem:[#allocation5 + $0x398] sm:$0xff] }
 0x12a   :  { %v453_v37 = vadd.f32 %v452_v36, %v412_v35  ;;  %v494_v46 = vadd.f32 %v493_v44, %v1836_v34  ;;  %v857_v36 = vld [vmem:[#allocation5 + $0x378] sm:$0xff]  ;;  %v816_v44 = vld [vmem:[#allocation5 + $0x230] sm:$0xff] }
 0x12b   :  { %990 = vmatpush.msrb.mxu3 %v857_v36  ;;  %1070 = vmatpush.msrb.mxu1 %v816_v44  ;;  %v799_v36 = vld [vmem:[#allocation5 + $0x1a8] sm:$0xff]  ;;  %v845_v44 = vld [vmem:[#allocation5 + $0x318] sm:$0xff] }
 0x12c   :  { %v537_v39 = vpop.f32.mrf.mxu0  ;;  %v1842_v19 = vmax.f32 %v453_v37, 0.0  ;;  %v578_v41 = vpop.f32.mrf.mxu1  ;;  %v535_v42 = vadd.f32 %v534_v24, %v494_v46  ;;  %v826_v24 = vld [vmem:[#allocation5 + $0x280] sm:$0xff]  ;;  %v823_v37 = vld [vmem:[#allocation5 + $0x268] sm:$0xff] }
 0x12d   :  { %1190 = vmatpush.msra.mxu0 %v826_v24  ;;  %991 = vmatpush.msrb.mxu3 %v854_v40  ;;  %v842_v40 = vld [vmem:[#allocation5 + $0x300] sm:$0xff] }
 0x12e   :  { %914 = vmatmul.f32.vlgmr.msra.gmra.mxu1 %v1842_v19  ;;  %1037 = vmatmul.f32.vlgmr.msrb.gmra.mxu0 %v1842_v19  ;;  %v576_v3 = vadd.f32 %v575_v18, %v535_v42  ;;  %v813_v42 = vld [vmem:[#allocation5 + $0x218] sm:$0xff] }
 0x12f   :  { %1191 = vmatpush.msra.mxu0 %v823_v37  ;;  %1071 = vmatpush.msrb.mxu1 %v813_v42  ;;  %v852_v42 = vld [vmem:[#allocation5 + $0x350] sm:$0xff] }
 0x130   :  { %v1847_v51 = vmax.f32 %v576_v3, 0.0  ;;  %992 = vmatpush.msrb.mxu3 %v851_v1 }
 0x131   :  { %v455_v38 = vpop.f32.mrf.mxu2  ;;  %v496_v54 = vpop.f32.mrf.mxu3  ;;  %1192 = vmatpush.msra.mxu0 %v820_v20 }
 0x132   :  { %v456_v53 = vadd.f32 %v455_v38, %v415_v50  ;;  %v497_v59 = vadd.f32 %v496_v54, %v1836_v34  ;;  %955 = vmatmul.f32.vlgmr.msrb.gmra.mxu2 %v1847_v51  ;;  %993 = vmatpush.msrb.mxu3 %v848_v26 }
 0x133   :  { %1193 = vmatpush.msra.mxu0 %v817_v25 }
 0x134   :  { %v540_v56 = vpop.f32.mrf.mxu0  ;;  %v1853_v32 = vmax.f32 %v456_v53, 0.0  ;;  %v581_v30 = vpop.f32.mrf.mxu1  ;;  %v538_v33 = vadd.f32 %v537_v39, %v497_v59  ;;  %v873_v39 = vld [vmem:[#allocation5 + $0x3f8] sm:$0xff]  ;;  %v810_v53 = vld [vmem:[#allocation5 + $0x200] sm:$0xff]  ;;  %v867_v59 = vld [vmem:[#allocation5 + $0x3c8] sm:$0xff]  ;;  %994 = vmatpush.msrb.mxu3 %v845_v44 }
 0x135   :  { %1108 = vmatpush.msra.mxu2 %v873_v39  ;;  %1072 = vmatpush.msrb.mxu1 %v810_v53  ;;  %v796_v39 = vld [vmem:[#allocation5 + $0x190] sm:$0xff]  ;;  %v846_v53 = vld [vmem:[#allocation5 + $0x320] sm:$0xff] }
 0x136   :  { %917 = vmatmul.f32.gmra.mxu1 %v1853_v32  ;;  %1040 = vmatmul.f32.gmra.mxu0 %v1853_v32  ;;  %v579_v17 = vadd.f32 %v578_v41, %v538_v33  ;;  %v811_v33 = vld [vmem:[#allocation5 + $0x208] sm:$0xff] }
 0x137   :  { %1109 = vmatpush.msra.mxu2 %v870_v48  ;;  %1073 = vmatpush.msrb.mxu1 %v807_v57 }
 0x138   :  { %v1858_v49 = vmax.f32 %v579_v17, 0.0  ;;  %995 = vmatpush.msrb.mxu3 %v842_v40 }
 0x139   :  { %v458_v23 = vpop.f32.mrf.mxu2  ;;  %v499_v18 = vpop.f32.mrf.mxu3  ;;  %1110 = vmatpush.msra.mxu2 %v867_v59  ;;  %1074 = vmatpush.msrb.mxu1 %v804_v6  ;;  %v392_v6 = vadd.f32 %v1829_v31, %v1827_v12 }
 0x13a   :  { %v459_v2 = vadd.f32 %v458_v23, %v418_v13  ;;  %v500_v8 = vadd.f32 %v499_v18, %v1836_v34  ;;  %958 = vmatmul.f32.gmra.mxu2 %v1858_v49 }
 0x13b   :  { %1075 = vmatpush.msrb.mxu1 %v801_v28  ;;  %v889_v28 = vld [vmem:[#allocation5 + $0x478] sm:$0xff] }
 0x13c   :  { %v543_v14 = vpop.f32.mrf.mxu0  ;;  %v1864_v4 = vmax.f32 %v459_v2, 0.0  ;;  %v541_v35 = vadd.f32 %v540_v56, %v500_v8  ;;  %v584_v46 = vpop.f32.mrf.mxu1  ;;  %v814_v56 = vld [vmem:[#allocation5 + $0x220] sm:$0xff]  ;;  %v386_v2 = vadd.f32 %v1799_v10, %v1827_v12  ;;  %v795_v10 = vld [vmem:[#allocation5 + $0x188] sm:$0xff] }
 0x13d   :  { %1194 = vmatpush.msra.mxu0 %v814_v56  ;;  %v858_v8 = vld [vmem:[#allocation5 + $0x380] sm:$0xff]  ;;  %1076 = vmatpush.msrb.mxu1 %v798_v27  ;;  %v793_v56 = vld [vmem:[#allocation5 + $0x178] sm:$0xff] }
 0x13e   :  { %920 = vmatmul.f32.gmra.mxu1 %v1864_v4  ;;  %1043 = vmatmul.f32.gmra.mxu0 %v1864_v4  ;;  %v582_v41 = vadd.f32 %v581_v30, %v541_v35  ;;  %v864_v30 = vld [vmem:[#allocation5 + $0x3b0] sm:$0xff]  ;;  %v855_v35 = vld [vmem:[#allocation5 + $0x368] sm:$0xff] }
 0x13f   :  { %1111 = vmatpush.msra.mxu2 %v864_v30  ;;  %1195 = vmatpush.msra.mxu0 %v811_v33 }
 0x140   :  { %v1869_v29 = vmax.f32 %v582_v41, 0.0  ;;  %1077 = vmatpush.msrb.mxu1 %v795_v10  ;;  %1144 = vmatpush.msra.mxu3 %v793_v56  ;;  %v880_v10 = vld [vmem:[#allocation5 + $0x430] sm:$0xff]  ;;  %v871_v56 = vld [vmem:[#allocation5 + $0x3e8] sm:$0xff] }
 0x141   :  { %v461_v47 = vpop.f32.mrf.mxu2  ;;  %v502_v50 = vpop.f32.mrf.mxu3  ;;  %1196 = vmatpush.msra.mxu0 %v808_v16  ;;  %1112 = vmatpush.msra.mxu2 %v861_v0  ;;  %v787_v0 = vld [vmem:[#allocation5 + $0x148] sm:$0xff] }
 0x142   :  { %v462_v3 = vadd.f32 %v461_v47, %v421_v43  ;;  %v503_v38 = vadd.f32 %v502_v50, %v1836_v34  ;;  %961 = vmatmul.f32.gmra.mxu2 %v1869_v29  ;;  %1226 = vmatpush.msra.mxu1 %v889_v28 }
 0x143   :  { %1197 = vmatpush.msra.mxu0 %v805_v55  ;;  %1113 = vmatpush.msra.mxu2 %v858_v8 }
 0x144   :  { %v546_v52 = vpop.f32.mrf.mxu0  ;;  %v1875_v54 = vmax.f32 %v462_v3, 0.0  ;;  %v544_v61 = vadd.f32 %v543_v14, %v503_v38  ;;  %v587_v63 = vpop.f32.mrf.mxu1  ;;  %v802_v14 = vld [vmem:[#allocation5 + $0x1c0] sm:$0xff]  ;;  %v389_v3 = vadd.f32 %v1810_v62, %v1827_v12  ;;  %v849_v38 = vld [vmem:[#allocation5 + $0x338] sm:$0xff]  ;;  %v843_v62 = vld [vmem:[#allocation5 + $0x308] sm:$0xff] }
 0x145   :  { %1198 = vmatpush.msra.mxu0 %v802_v14  ;;  %1114 = vmatpush.msra.mxu2 %v855_v35  ;;  %v886_v12 = vld [vmem:[#allocation5 + $0x460] sm:$0xff]  ;;  %v781_v35 = vld [vmem:[#allocation5 + $0x118] sm:$0xff] }
 0x146   :  { %923 = vmatmul.f32.gmra.mxu1 %v1875_v54  ;;  %1046 = vmatmul.f32.gmra.mxu0 %v1875_v54  ;;  %v585_v5 = vadd.f32 %v584_v46, %v544_v61  ;;  %v427_v46 = vadd.f32 %v1801_v22, %v386_v2  ;;  %v430_v59 = vadd.f32 %v1812_v9, %v389_v3  ;;  %v790_v61 = vld [vmem:[#allocation5 + $0x160] sm:$0xff] }
 0x147   :  { %1199 = vmatpush.msra.mxu0 %v799_v36  ;;  %1115 = vmatpush.msra.mxu2 %v852_v42  ;;  %v883_v36 = vld [vmem:[#allocation5 + $0x448] sm:$0xff] }
 0x148   :  { %v1880_v15 = vmax.f32 %v585_v5, 0.0  ;;  %1145 = vmatpush.msra.mxu3 %v790_v61  ;;  %1227 = vmatpush.msra.mxu1 %v886_v12  ;;  %v766_v61 = vld [vmem:[#allocation5 + $0xa0] sm:$0xff]  ;;  %v856_v12 = vld [vmem:[#allocation5 + $0x370] sm:$0xff] }
 0x149   :  { %v464_v17 = vpop.f32.mrf.mxu2  ;;  %v505_v23 = vpop.f32.mrf.mxu3  ;;  %1200 = vmatpush.msra.mxu0 %v796_v39  ;;  %1116 = vmatpush.msra.mxu2 %v849_v38 }
 0x14a   :  { %v465_v13 = vadd.f32 %v464_v17, %v424_v7  ;;  %v506_v24 = vadd.f32 %v505_v23, %v1836_v34  ;;  %964 = vmatmul.f32.gmra.mxu2 %v1880_v15  ;;  %v433_v17 = vadd.f32 %v1831_v58, %v392_v6  ;;  %1146 = vmatpush.msra.mxu3 %v787_v0  ;;  %v865_v6 = vld [vmem:[#allocation5 + $0x3b8] sm:$0xff] }
 0x14b   :  { %1117 = vmatpush.msra.mxu2 %v846_v53  ;;  %1228 = vmatpush.msra.mxu1 %v883_v36 }
 0x14c   :  { %v549_v60 = vpop.f32.mrf.mxu0  ;;  %v1886_v18 = vmax.f32 %v465_v13, 0.0  ;;  %v547_v11 = vadd.f32 %v546_v52, %v506_v24  ;;  %v590_v43 = vpop.f32.mrf.mxu1  ;;  %v784_v13 = vld [vmem:[#allocation5 + $0x130] sm:$0xff] }
 0x14d   :  { %1118 = vmatpush.msra.mxu2 %v843_v62  ;;  %1147 = vmatpush.msra.mxu3 %v784_v13  ;;  %v868_v62 = vld [vmem:[#allocation5 + $0x3d0] sm:$0xff] }
 0x14e   :  { %926 = vmatmul.f32.gmra.mxu1 %v1886_v18  ;;  %1049 = vmatmul.f32.gmra.mxu0 %v1886_v18  ;;  %v588_v37 = vadd.f32 %v587_v63, %v547_v11  ;;  %v1922_v11 = vperm.slane %v1821_v45, 2 }
 0x14f   :  { %1148 = vmatpush.msra.mxu3 %v781_v35  ;;  %1229 = vmatpush.msra.mxu1 %v880_v10  ;;  %v850_v35 = vld [vmem:[#allocation5 + $0x340] sm:$0xff]  ;;  %v847_v10 = vld [vmem:[#allocation5 + $0x328] sm:$0xff] }
 0x150   :  { %v1891_v20 = vmax.f32 %v588_v37, 0.0 }
 0x151   :  { %v467_v41 = vpop.f32.mrf.mxu2  ;;  %v508_v48 = vpop.f32.mrf.mxu3 }
 0x152   :  { %v468_v47 = vadd.f32 %v467_v41, %v427_v46  ;;  %v509_v25 = vadd.f32 %v508_v48, %v1836_v34  ;;  %967 = vmatmul.f32.gmra.mxu2 %v1891_v20  ;;  %v772_v48 = vld [vmem:[#allocation5 + $0xd0] sm:$0xff] }
 0x154   :  { %v552_v22 = vpop.f32.mrf.mxu0  ;;  %v1897_v50 = vmax.f32 %v468_v47, 0.0  ;;  %v550_v52 = vadd.f32 %v549_v60, %v509_v25  ;;  %v593_v9 = vpop.f32.mrf.mxu1  ;;  %v877_v47 = vld [vmem:[#allocation5 + $0x418] sm:$0xff] }
 0x155   :  { %1230 = vmatpush.msra.mxu1 %v877_v47 }
 0x156   :  { %929 = vmatmul.f32.gmra.mxu1 %v1897_v50  ;;  %1052 = vmatmul.f32.gmra.mxu0 %v1897_v50  ;;  %v591_v21 = vadd.f32 %v590_v43, %v550_v52  ;;  %v775_v43 = vld [vmem:[#allocation5 + $0xe8] sm:$0xff] }
 0x158   :  { %v1902_v57 = vmax.f32 %v591_v21, 0.0 }
 0x159   :  { %v470_v1 = vpop.f32.mrf.mxu2  ;;  %v511_v33 = vpop.f32.mrf.mxu3 }
 0x15a   :  { %v471_v30 = vadd.f32 %v470_v1, %v430_v59  ;;  %v512_v5 = vadd.f32 %v511_v33, %v1836_v34  ;;  %970 = vmatmul.f32.gmra.mxu2 %v1902_v57  ;;  %v769_v59 = vld [vmem:[#allocation5 + $0xb8] sm:$0xff] }
 0x15c   :  { %v555_v26 = vpop.f32.mrf.mxu0  ;;  %v1908_v7 = vmax.f32 %v471_v30, 0.0  ;;  %v553_v63 = vadd.f32 %v552_v22, %v512_v5  ;;  %v596_v14 = vpop.f32.mrf.mxu1  ;;  %v874_v22 = vld [vmem:[#allocation5 + $0x400] sm:$0xff] }
 0x15d   :  { %1231 = vmatpush.msra.mxu1 %v874_v22 }
 0x15e   :  { %932 = vmatmul.f32.gmra.mxu1 %v1908_v7  ;;  %1055 = vmatmul.f32.gmra.mxu0 %v1908_v7  ;;  %v594_v16 = vadd.f32 %v593_v9, %v553_v63  ;;  %v763_v63 = vld [vmem:[#allocation5 + $0x88] sm:$0xff] }
 0x15f   :  { %1232 = vmatpush.msra.mxu1 %v871_v56 }
 0x160   :  { %v1913_v55 = vmax.f32 %v594_v16, 0.0  ;;  %v760_v16 = vld [vmem:[#allocation5 + $0x70] sm:$0xff] }
 0x161   :  { %v473_v23 = vpop.f32.mrf.mxu2  ;;  %v514_v24 = vpop.f32.mrf.mxu3  ;;  %1233 = vmatpush.msra.mxu1 %v868_v62 }
 0x162   :  { %v474_v31 = vadd.f32 %v473_v23, %v433_v17  ;;  %v515_v60 = vadd.f32 %v514_v24, %v1836_v34  ;;  %973 = vmatmul.f32.gmra.mxu2 %v1913_v55  ;;  %v778_v34 = vld [vmem:[#allocation5 + $0x100] sm:$0xff]  ;;  %v859_v23 = vld [vmem:[#allocation5 + $0x388] sm:$0xff] }
 0x163   :  { %1149 = vmatpush.msra.mxu3 %v778_v34  ;;  %1234 = vmatpush.msra.mxu1 %v865_v6  ;;  %v862_v17 = vld [vmem:[#allocation5 + $0x3a0] sm:$0xff] }
 0x164   :  { %v698_v2 = vpop.f32.mrf.mxu0  ;;  %v1917_v8 = vmax.f32 %v474_v31, 0.0  ;;  %v556_v58 = vadd.f32 %v555_v26, %v515_v60  ;;  %v853_v60 = vld [vmem:[#allocation5 + $0x358] sm:$0xff] }
 0x165   :  { %1150 = vmatpush.msra.mxu3 %v775_v43  ;;  %1235 = vmatpush.msra.mxu1 %v862_v17 }
 0x166   :  { %935 = vmatmul.f32.gmra.mxu1 %v1917_v8  ;;  %1058 = vmatmul.f32.gmra.mxu0 %v1917_v8  ;;  %v597_v27 = vadd.f32 %v596_v14, %v556_v58  ;;  %v757_v58 = vld [vmem:[#allocation5 + $0x58] sm:$0xff]  ;;  %v754_v14 = vld [vmem:[#allocation5 + $0x40] sm:$0xff] }
 0x167   :  { %1151 = vmatpush.msra.mxu3 %v772_v48  ;;  %1236 = vmatpush.msra.mxu1 %v859_v23 }
 0x168   :  { %v1924_v44 = vmax.f32 %v597_v27, 0.0 }
 0x169   :  { %v616_v37 = vpop.f32.mrf.mxu2  ;;  %v657_v39 = vpop.f32.mrf.mxu3  ;;  %1152 = vmatpush.msra.mxu3 %v769_v59  ;;  %1237 = vmatpush.msra.mxu1 %v856_v12 }
 0x16a   :  { %v617_v46 = vadd.f32 %v616_v37, %v1922_v11  ;;  %976 = vmatmul.f32.gmra.mxu2 %v1924_v44 }
 0x16b   :  { %1153 = vmatpush.msra.mxu3 %v766_v61  ;;  %1238 = vmatpush.msra.mxu1 %v853_v60 }
 0x16c   :  { %v701_v40 = vpop.f32.mrf.mxu0  ;;  %v658_v41 = vadd.f32 %v657_v39, %v617_v46  ;;  %v748_v46 = vld [vmem:[#allocation5 + $0x10] sm:$0xff] }
 0x16d   :  { %1154 = vmatpush.msra.mxu3 %v763_v63  ;;  %1239 = vmatpush.msra.mxu1 %v850_v35 }
 0x16e   :  { %v699_v45 = vadd.f32 %v698_v2, %v658_v41  ;;  %1078 = vmatmul.f32.vlgmr.msrb.gmra.mxu1 %v1847_v51  ;;  %1201 = vmatmul.f32.vlgmr.msra.gmra.mxu0 %v1847_v51 }
 0x16f   :  { %1155 = vmatpush.msra.mxu3 %v760_v16  ;;  %1240 = vmatpush.msra.mxu1 %v847_v10 }
 0x170   :  { %v1930_v42 = vmax.f32 %v699_v45, 0.0 }
 0x171   :  { %v619_v25 = vpop.f32.mrf.mxu2  ;;  %v660_v38 = vpop.f32.mrf.mxu3  ;;  %1156 = vmatpush.msra.mxu3 %v757_v58 }
 0x172   :  { %v620_v3 = vadd.f32 %v619_v25, %v1922_v11  ;;  %996 = vmatmul.f32.vlgmr.msrb.gmra.mxu3 %v1930_v42  ;;  %1119 = vmatmul.f32.vlgmr.msra.gmra.mxu2 %v1930_v42 }
 0x173   :  { %1157 = vmatpush.msra.mxu3 %v754_v14 }
 0x174   :  { %v704_v52 = vpop.f32.mrf.mxu0  ;;  %v661_v53 = vadd.f32 %v660_v38, %v620_v3 }
 0x176   :  { %v702_v51 = vadd.f32 %v701_v40, %v661_v53  ;;  %1081 = vmatmul.f32.gmra.mxu1 %v1858_v49  ;;  %1204 = vmatmul.f32.gmra.mxu0 %v1858_v49  ;;  %v844_v40 = vld [vmem:[#allocation5 + $0x310] sm:$0xff] }
 0x177   :  { %1241 = vmatpush.msra.mxu1 %v844_v40 }
 0x178   :  { %v1937_v21 = vmax.f32 %v702_v51, 0.0 }
 0x179   :  { %v622_v1 = vpop.f32.mrf.mxu2  ;;  %v663_v33 = vpop.f32.mrf.mxu3 }
 0x17a   :  { %v623_v30 = vadd.f32 %v622_v1, %v1922_v11  ;;  %999 = vmatmul.f32.gmra.mxu3 %v1937_v21  ;;  %1122 = vmatmul.f32.gmra.mxu2 %v1937_v21 }
 0x17c   :  { %v664_v5 = vadd.f32 %v663_v33, %v623_v30  ;;  %v707_v49 = vpop.f32.mrf.mxu0 }
 0x17e   :  { %v705_v26 = vadd.f32 %v704_v52, %v664_v5  ;;  %1084 = vmatmul.f32.gmra.mxu1 %v1869_v29  ;;  %1207 = vmatmul.f32.gmra.mxu0 %v1869_v29 }
 0x180   :  { %v1944_v9 = vmax.f32 %v705_v26, 0.0 }
 0x181   :  { %v625_v0 = vpop.f32.mrf.mxu2  ;;  %v666_v13 = vpop.f32.mrf.mxu3 }
 0x182   :  { %v626_v28 = vadd.f32 %v625_v0, %v1922_v11  ;;  %1002 = vmatmul.f32.gmra.mxu3 %v1944_v9  ;;  %1125 = vmatmul.f32.gmra.mxu2 %v1944_v9 }
 0x184   :  { %v667_v29 = vadd.f32 %v666_v13, %v626_v28  ;;  %v710_v24 = vpop.f32.mrf.mxu0 }
 0x186   :  { %v708_v31 = vadd.f32 %v707_v49, %v667_v29  ;;  %1087 = vmatmul.f32.gmra.mxu1 %v1880_v15  ;;  %1210 = vmatmul.f32.gmra.mxu0 %v1880_v15  ;;  %v751_v15 = vld [vmem:[#allocation5 + $0x28] sm:$0xff] }
 0x187   :  { %1158 = vmatpush.msra.mxu3 %v751_v15 }
 0x188   :  { %v1951_v2 = vmax.f32 %v708_v31, 0.0 }
 0x189   :  { %v628_v27 = vpop.f32.mrf.mxu2  ;;  %v669_v34 = vpop.f32.mrf.mxu3  ;;  %1159 = vmatpush.msra.mxu3 %v748_v46 }
 0x18a   :  { %v629_v36 = vadd.f32 %v628_v27, %v1922_v11  ;;  %1005 = vmatmul.f32.gmra.mxu3 %v1951_v2  ;;  %1128 = vmatmul.f32.gmra.mxu2 %v1951_v2 }
 0x18c   :  { %v670_v37 = vadd.f32 %v669_v34, %v629_v36  ;;  %v713_v45 = vpop.f32.mrf.mxu0 }
 0x18e   :  { %v711_v39 = vadd.f32 %v710_v24, %v670_v37  ;;  %1090 = vmatmul.f32.gmra.mxu1 %v1891_v20  ;;  %1213 = vmatmul.f32.gmra.mxu0 %v1891_v20 }
 0x190   :  { %v736_v41 = vmax.f32 %v711_v39, 0.0 }
 0x191   :  { %v631_v43 = vpop.f32.mrf.mxu2  ;;  %v672_v48 = vpop.f32.mrf.mxu3 }
 0x192   :  { %v632_v47 = vadd.f32 %v631_v43, %v1922_v11  ;;  %1008 = vmatmul.f32.gmra.mxu3 %v736_v41  ;;  %1131 = vmatmul.f32.gmra.mxu2 %v736_v41 }
 0x194   :  { %v673_v25 = vadd.f32 %v672_v48, %v632_v47  ;;  %v716_v53 = vpop.f32.mrf.mxu0 }
 0x196   :  { %v714_v22 = vadd.f32 %v713_v45, %v673_v25  ;;  %1093 = vmatmul.f32.gmra.mxu1 %v1902_v57  ;;  %1216 = vmatmul.f32.gmra.mxu0 %v1902_v57 }
 0x198   :  { %v739_v3 = vmax.f32 %v714_v22, 0.0 }
 0x199   :  { %v634_v20 = vpop.f32.mrf.mxu2  ;;  %v675_v52 = vpop.f32.mrf.mxu3 }
 0x19a   :  { %v635_v38 = vadd.f32 %v634_v20, %v1922_v11  ;;  %1011 = vmatmul.f32.gmra.mxu3 %v739_v3  ;;  %1134 = vmatmul.f32.gmra.mxu2 %v739_v3 }
 0x19c   :  { %v676_v51 = vadd.f32 %v675_v52, %v635_v38  ;;  %v719_v30 = vpop.f32.mrf.mxu0 }
 0x19e   :  { %v717_v59 = vadd.f32 %v716_v53, %v676_v51  ;;  %1096 = vmatmul.f32.gmra.mxu1 %v1913_v55  ;;  %1219 = vmatmul.f32.gmra.mxu0 %v1913_v55 }
 0x1a0   :  { %v742_v56 = vmax.f32 %v717_v59, 0.0 }
 0x1a1   :  { %v637_v61 = vpop.f32.mrf.mxu2  ;;  %v678_v57 = vpop.f32.mrf.mxu3 }
 0x1a2   :  { %v638_v1 = vadd.f32 %v637_v61, %v1922_v11  ;;  %1014 = vmatmul.f32.gmra.mxu3 %v742_v56  ;;  %1137 = vmatmul.f32.gmra.mxu2 %v742_v56 }
 0x1a4   :  { %v679_v62 = vadd.f32 %v678_v57, %v638_v1 }
 0x1a6   :  { %v720_v33 = vadd.f32 %v719_v30, %v679_v62  ;;  %1099 = vmatmul.f32.gmra.mxu1 %v1924_v44  ;;  %1222 = vmatmul.f32.gmra.mxu0 %v1924_v44 }
 0x1a8   :  { %v745_v5 = vmax.f32 %v720_v33, 0.0 }
 0x1aa   :  { %1017 = vmatmul.f32.gmra.mxu3 %v745_v5  ;;  %1140 = vmatmul.f32.gmra.mxu2 %v745_v5 }
 0x1ab   :  { %v915_v49 = vpop.f32.mrf.mxu1 }
 0x1ae   :  { %1242 = vmatmul.f32.vlgmr.msra.gmra.mxu1 %v1930_v42 }
 0x1b2   :  { %1160 = vmatmul.f32.vlgmr.msra.gmra.mxu3 %v1842_v19 }
 0x1b3   :  { %v918_v55 = vpop.f32.mrf.mxu1 }
 0x1b5   :  { %v956_v42 = vpop.f32.mrf.mxu2 }
 0x1b6   :  { %1245 = vmatmul.f32.gmra.mxu1 %v1937_v21  ;;  %v1976_v21 = vpop.f32.mrf.mxu0 }
 0x1ba   :  { %1163 = vmatmul.f32.gmra.mxu3 %v1853_v32 }
 0x1bb   :  { %v921_v11 = vpop.f32.mrf.mxu1 }
 0x1bd   :  { %v959_v32 = vpop.f32.mrf.mxu2 }
 0x1be   :  { %1248 = vmatmul.f32.gmra.mxu1 %v1944_v9 }
 0x1c2   :  { %1166 = vmatmul.f32.gmra.mxu3 %v1864_v4  ;;  %v1980_v4 = vpop.f32.mrf.mxu0 }
 0x1c3   :  { %v924_v26 = vpop.f32.mrf.mxu1 }
 0x1c6   :  { %1251 = vmatmul.f32.gmra.mxu1 %v1951_v2 }
 0x1ca   :  { %1169 = vmatmul.f32.gmra.mxu3 %v1875_v54  ;;  %v962_v54 = vpop.f32.mrf.mxu2  ;;  %v1986_v16 = vpop.f32.mrf.mxu0 }
 0x1cb   :  { %v927_v44 = vpop.f32.mrf.mxu1 }
 0x1ce   :  { %1254 = vmatmul.f32.gmra.mxu1 %v736_v41 }
 0x1d2   :  { %1172 = vmatmul.f32.gmra.mxu3 %v1886_v18  ;;  %v890_v18 = vld [vmem:[%s2145_s6] sm:$0x7]  ;;  %v1992_v29 = vpop.f32.mrf.mxu0 }
 0x1d3   :  { %v930_v19 = vpop.f32.mrf.mxu1  ;;  %v892_v17 = vperm.slane %v890_v18, 0 }
 0x1d5   :  { %v916_v0 = vadd.f32 %v915_v49, %v892_v17  ;;  %v922_v14 = vadd.f32 %v921_v11, %v892_v17  ;;  %v925_v37 = vadd.f32 %v924_v26, %v892_v17  ;;  %v928_v43 = vadd.f32 %v927_v44, %v892_v17 }
 0x1d6   :  { %1257 = vmatmul.f32.gmra.mxu1 %v739_v3  ;;  %v931_v38 = vadd.f32 %v930_v19, %v892_v17 }
 0x1d7   :  { %v963_v36 = vadd.f32 %v962_v54, %v922_v14 }
 0x1da   :  { %1175 = vmatmul.f32.gmra.mxu3 %v1897_v50  ;;  %v965_v50 = vpop.f32.mrf.mxu2  ;;  %v1998_v58 = vpop.f32.mrf.mxu0 }
 0x1db   :  { %v933_v6 = vpop.f32.mrf.mxu1  ;;  %v966_v39 = vadd.f32 %v965_v50, %v925_v37  ;;  %v1291_v50 = vld [vmem:[%s2146_s7] sm:$0x7] }
 0x1dc   :  { %v934_v1 = vadd.f32 %v933_v6, %v892_v17  ;;  %v2048_v37 = vperm.slane %v1291_v50, 2 }
 0x1de   :  { %1260 = vmatmul.f32.gmra.mxu1 %v742_v56 }
 0x1e2   :  { %1178 = vmatmul.f32.gmra.mxu3 %v1908_v7  ;;  %v957_v7 = vadd.f32 %v956_v42, %v916_v0  ;;  %v968_v12 = vpop.f32.mrf.mxu2  ;;  %v2004_v10 = vpop.f32.mrf.mxu0  ;;  %v2035_v0 = vperm.slane %v890_v18, 2 }
 0x1e3   :  { %v936_v9 = vpop.f32.mrf.mxu1  ;;  %v969_v48 = vadd.f32 %v968_v12, %v928_v43 }
 0x1e6   :  { %1263 = vmatmul.f32.gmra.mxu1 %v745_v5  ;;  %v2026_v5 = vperm.slane %v890_v18, 1 }
 0x1e8   :  { %v1039_v42 = vadd.f32 %v1976_v21, %v2026_v5 }
 0x1ea   :  { %1181 = vmatmul.f32.gmra.mxu3 %v1917_v8  ;;  %v919_v8 = vadd.f32 %v918_v55, %v892_v17  ;;  %v971_v27 = vpop.f32.mrf.mxu2  ;;  %v2012_v25 = vpop.f32.mrf.mxu0  ;;  %v937_v55 = vadd.f32 %v936_v9, %v892_v17  ;;  %v2038_v17 = vperm.slane %v1291_v50, 0 }
 0x1eb   :  { %v1079_v63 = vpop.f32.mrf.mxu1  ;;  %v972_v53 = vadd.f32 %v971_v27, %v931_v38 }
 0x1ec   :  { %v960_v24 = vadd.f32 %v959_v32, %v919_v8  ;;  %v1080_v6 = vadd.f32 %v1079_v63, %v1039_v42  ;;  %v2040_v8 = vperm.slane %v1291_v50, 1  ;;  %v1042_v63 = vadd.f32 %v1980_v4, %v2026_v5 }
 0x1f2   :  { %v974_v40 = vpop.f32.mrf.mxu2  ;;  %v2020_v56 = vpop.f32.mrf.mxu0 }
 0x1f3   :  { %v1988_v28 = vpop.f32.mrf.mxu1  ;;  %v975_v62 = vadd.f32 %v974_v40, %v934_v1  ;;  %v1045_v40 = vadd.f32 %v1986_v16, %v2026_v5 }
 0x1f4   :  { %v1083_v14 = vadd.f32 %v1988_v28, %v1042_v63  ;;  %v1051_v63 = vadd.f32 %v1998_v58, %v2026_v5 }
 0x1f5   :  { %v997_v13 = vpop.f32.mrf.mxu3 }
 0x1f6   :  { %v1990_v23 = vadd.f32 %v997_v13, %v957_v7 }
 0x1f8   :  { %v1267_v9 = vmax.f32 %v1990_v23, 0.0 }
 0x1fa   :  { %v977_v3 = vpop.f32.mrf.mxu2  ;;  %v1202_v49 = vpop.f32.mrf.mxu0  ;;  %v1299_v27 = vmul.f32 %v2038_v17, %v1267_v9 }
 0x1fb   :  { %v1994_v31 = vpop.f32.mrf.mxu1  ;;  %v978_v44 = vadd.f32 %v977_v3, %v937_v55 }
 0x1fd   :  { %v1000_v60 = vpop.f32.mrf.mxu3 }
 0x1fe   :  { %v1996_v2 = vadd.f32 %v1000_v60, %v960_v24 }
 0x202   :  { %v1120_v61 = vpop.f32.mrf.mxu2  ;;  %v1205_v7 = vpop.f32.mrf.mxu0 }
 0x203   :  { %v2000_v35 = vpop.f32.mrf.mxu1  ;;  %v1121_v54 = vadd.f32 %v1120_v61, %v1080_v6 }
 0x205   :  { %v1003_v34 = vpop.f32.mrf.mxu3  ;;  %v1268_v12 = vmax.f32 %v1121_v54, 0.0 }
 0x206   :  { %v2002_v15 = vadd.f32 %v1003_v34, %v963_v36 }
 0x207   :  { %v1300_v36 = vmul.f32 %v2040_v8, %v1268_v12 }
 0x209   :  { %v1323_v4 = vadd.f32 %v1300_v36, %v1299_v27 }
 0x20a   :  { %v1123_v11 = vpop.f32.mrf.mxu2 }
 0x20b   :  { %v2006_v46 = vpop.f32.mrf.mxu1  ;;  %v1124_v23 = vadd.f32 %v1123_v11, %v1083_v14 }
 0x20d   :  { %v1006_v41 = vpop.f32.mrf.mxu3 }
 0x20e   :  { %v2008_v45 = vadd.f32 %v1006_v41, %v966_v39  ;;  %v1208_v41 = vpop.f32.mrf.mxu0 }
 0x212   :  { %v1126_v13 = vpop.f32.mrf.mxu2 }
 0x213   :  { %v2010_v47 = vpop.f32.mrf.mxu1 }
 0x215   :  { %v1009_v22 = vpop.f32.mrf.mxu3 }
 0x216   :  { %v2014_v20 = vadd.f32 %v1009_v22, %v969_v48  ;;  %v1270_v48 = vmax.f32 %v1996_v2, 0.0  ;;  %v1271_v22 = vmax.f32 %v1124_v23, 0.0  ;;  %v1273_v2 = vmax.f32 %v2002_v15, 0.0  ;;  %v1211_v6 = vpop.f32.mrf.mxu0 }
 0x217   :  { %v1092_v23 = vadd.f32 %v2006_v46, %v1051_v63  ;;  %v1054_v46 = vadd.f32 %v2004_v10, %v2026_v5  ;;  %v1057_v10 = vadd.f32 %v2012_v25, %v2026_v5 }
 0x218   :  { %v1303_v16 = vmul.f32 %v2040_v8, %v1271_v22  ;;  %v1305_v9 = vmul.f32 %v2038_v17, %v1273_v2 }
 0x21a   :  { %v1129_v28 = vpop.f32.mrf.mxu2 }
 0x21b   :  { %v2016_v52 = vpop.f32.mrf.mxu1 }
 0x21d   :  { %v1012_v51 = vpop.f32.mrf.mxu3 }
 0x21e   :  { %v2018_v59 = vadd.f32 %v1012_v51, %v972_v53  ;;  %v1086_v53 = vadd.f32 %v1994_v31, %v1045_v40  ;;  %v1214_v40 = vpop.f32.mrf.mxu0 }
 0x222   :  { %v1132_v50 = vpop.f32.mrf.mxu2 }
 0x223   :  { %v2022_v57 = vpop.f32.mrf.mxu1 }
 0x225   :  { %v1015_v30 = vpop.f32.mrf.mxu3 }
 0x226   :  { %v2024_v33 = vadd.f32 %v1015_v30, %v975_v62  ;;  %v1127_v62 = vadd.f32 %v1126_v13, %v1086_v53  ;;  %v1302_v30 = vmul.f32 %v2038_v17, %v1270_v48  ;;  %v1217_v2 = vpop.f32.mrf.mxu0 }
 0x228   :  { %v1274_v11 = vmax.f32 %v1127_v62, 0.0 }
 0x22a   :  { %v1306_v15 = vmul.f32 %v2040_v8, %v1274_v11  ;;  %v1135_v58 = vpop.f32.mrf.mxu2 }
 0x22b   :  { %v1243_v26 = vpop.f32.mrf.mxu1 }
 0x22c   :  { %v1331_v14 = vadd.f32 %v1306_v15, %v1305_v9 }
 0x22d   :  { %v1018_v19 = vpop.f32.mrf.mxu3 }
 0x22e   :  { %v2030_v32 = vadd.f32 %v1018_v19, %v978_v44  ;;  %v1048_v44 = vadd.f32 %v1992_v29, %v2026_v5  ;;  %v1327_v19 = vadd.f32 %v1303_v16, %v1302_v30 }
 0x230   :  { %v1089_v54 = vadd.f32 %v2000_v35, %v1048_v44 }
 0x232   :  { %v1138_v11 = vpop.f32.mrf.mxu2 }
 0x233   :  { %v1246_v21 = vpop.f32.mrf.mxu1 }
 0x235   :  { %v1161_v24 = vpop.f32.mrf.mxu3 }
 0x236   :  { %v1162_v60 = vadd.f32 %v1161_v24, %v2035_v0 }
 0x238   :  { %v1203_v18 = vadd.f32 %v1202_v49, %v1162_v60 }
 0x23a   :  { %v1244_v34 = vadd.f32 %v1243_v26, %v1203_v18  ;;  %v1276_v18 = vmax.f32 %v2008_v45, 0.0 }
 0x23b   :  { %v1249_v51 = vpop.f32.mrf.mxu1 }
 0x23c   :  { %v1269_v39 = vmax.f32 %v1244_v34, 0.0 }
 0x23d   :  { %v1164_v43 = vpop.f32.mrf.mxu3 }
 0x23e   :  { %v1165_v3 = vadd.f32 %v1164_v43, %v2035_v0  ;;  %v1301_v38 = vmul.f32 %v2048_v37, %v1269_v39  ;;  %v1308_v43 = vmul.f32 %v2038_v17, %v1276_v18 }
 0x240   :  { %v1206_v61 = vadd.f32 %v1205_v7, %v1165_v3  ;;  %v1324_v1 = vadd.f32 %v1323_v4, %v1301_v38 }
 0x242   :  { %v1247_v49 = vadd.f32 %v1246_v21, %v1206_v61  ;;  %1325 = vadd.xlane.f32.xlu2 %v1324_v1  ;;  %v1130_v21 = vadd.f32 %v1129_v28, %v1089_v54  ;;  %v1279_v28 = vmax.f32 %v2014_v20, 0.0  ;;  %v1095_v1 = vadd.f32 %v2010_v47, %v1054_v46 }
 0x243   :  { %v1252_v12 = vpop.f32.mrf.mxu1  ;;  %v1282_v47 = vmax.f32 %v2018_v59, 0.0  ;;  %v1285_v59 = vmax.f32 %v2024_v33, 0.0 }
 0x244   :  { %v1272_v55 = vmax.f32 %v1247_v49, 0.0  ;;  %v1277_v35 = vmax.f32 %v1130_v21, 0.0  ;;  %v1311_v16 = vmul.f32 %v2038_v17, %v1279_v28 }
 0x245   :  { %v1167_v26 = vpop.f32.mrf.mxu3  ;;  %v1314_v15 = vmul.f32 %v2038_v17, %v1282_v47 }
 0x246   :  { %v1168_v31 = vadd.f32 %v1167_v26, %v2035_v0  ;;  %v1304_v42 = vmul.f32 %v2048_v37, %v1272_v55  ;;  %v1309_v4 = vmul.f32 %v2040_v8, %v1277_v35  ;;  %v1136_v55 = vadd.f32 %v1135_v58, %v1095_v1  ;;  %v1141_v35 = vpop.f32.mrf.mxu2 }
 0x248   :  { %v1209_v7 = vadd.f32 %v1208_v41, %v1168_v31  ;;  %v1328_v13 = vadd.f32 %v1327_v19, %v1304_v42  ;;  %v1133_v41 = vadd.f32 %v1132_v50, %v1092_v23  ;;  %v1335_v61 = vadd.f32 %v1309_v4, %v1308_v43 }
 0x249   :  { %v1283_v19 = vmax.f32 %v1136_v55, 0.0  ;;  %v1098_v50 = vadd.f32 %v2016_v52, %v1057_v10  ;;  %v1288_v4 = vmax.f32 %v2030_v32, 0.0 }
 0x24a   :  { %v1250_v24 = vadd.f32 %v1249_v51, %v1209_v7  ;;  %1329 = vadd.xlane.f32.xlu0 %v1328_v13  ;;  %v1280_v3 = vmax.f32 %v1133_v41, 0.0 }
 0x24b   :  { %v1255_v22 = vpop.f32.mrf.mxu1  ;;  %v1139_v9 = vadd.f32 %v1138_v11, %v1098_v50 }
 0x24c   :  { %v1275_v29 = vmax.f32 %v1250_v24, 0.0  ;;  %v1312_v49 = vmul.f32 %v2040_v8, %v1280_v3  ;;  %v1220_v24 = vpop.f32.mrf.mxu0 }
 0x24d   :  { %v1170_v60 = vpop.f32.mrf.mxu3 }
 0x24e   :  { %v1171_v27 = vadd.f32 %v1170_v60, %v2035_v0  ;;  %v1307_v36 = vmul.f32 %v2048_v37, %v1275_v29  ;;  %v1339_v42 = vadd.f32 %v1312_v49, %v1311_v16  ;;  %v1286_v29 = vmax.f32 %v1139_v9, 0.0 }
 0x24f   :  { %v1060_v60 = vadd.f32 %v2020_v56, %v2026_v5 }
 0x250   :  { %v1212_v34 = vadd.f32 %v1211_v6, %v1171_v27  ;;  %v1332_v39 = vadd.f32 %v1331_v14, %v1307_v36  ;;  %v1318_v33 = vmul.f32 %v2040_v8, %v1286_v29 }
 0x251   :  { %v1101_v36 = vadd.f32 %v2022_v57, %v1060_v60 }
 0x252   :  { %v1253_v48 = vadd.f32 %v1252_v12, %v1212_v34  ;;  %1333 = vadd.xlane.f32.xlu1 %v1332_v39  ;;  %v1315_v12 = vmul.f32 %v2040_v8, %v1283_v19  ;;  %v1317_v39 = vmul.f32 %v2038_v17, %v1285_v59 }
 0x253   :  { %v1258_v44 = vpop.f32.mrf.mxu1 }
 0x254   :  { %v1278_v45 = vmax.f32 %v1253_v48, 0.0  ;;  %v1343_v18 = vadd.f32 %v1315_v12, %v1314_v15  ;;  %v1347_v5 = vadd.f32 %v1318_v33, %v1317_v39  ;;  %v1223_v57 = vpop.f32.mrf.mxu0 }
 0x255   :  { %v1173_v38 = vpop.f32.mrf.mxu3 }
 0x256   :  { %v1174_v53 = vadd.f32 %v1173_v38, %v2035_v0  ;;  %v1310_v51 = vmul.f32 %v2048_v37, %v1278_v45  ;;  %v1320_v38 = vmul.f32 %v2038_v17, %v1288_v4 }
 0x258   :  { %v1215_v62 = vadd.f32 %v1214_v40, %v1174_v53  ;;  %v1336_v30 = vadd.f32 %v1335_v61, %v1310_v51  ;;  %v1142_v40 = vadd.f32 %v1141_v35, %v1101_v36 }
 0x25a   :  { %v1256_v20 = vadd.f32 %v1255_v22, %v1215_v62  ;;  %1337 = vadd.xlane.f32.xlu2 %v1336_v30  ;;  %v1289_v58 = vmax.f32 %v1142_v40, 0.0 }
 0x25b   :  { %v1261_v27 = vpop.f32.mrf.mxu1 }
 0x25c   :  { %v1281_v26 = vmax.f32 %v1256_v20, 0.0  ;;  %v1321_v46 = vmul.f32 %v2040_v8, %v1289_v58 }
 0x25d   :  { %v1176_v31 = vpop.f32.mrf.mxu3 }
 0x25e   :  { %v1177_v6 = vadd.f32 %v1176_v31, %v2035_v0  ;;  %v1313_v54 = vmul.f32 %v2048_v37, %v1281_v26  ;;  %v1351_v1 = vadd.f32 %v1321_v46, %v1320_v38 }
 0x260   :  { %v1218_v7 = vadd.f32 %v1217_v2, %v1177_v6  ;;  %v1340_v13 = vadd.f32 %v1339_v42, %v1313_v54 }
 0x262   :  { %v1259_v25 = vadd.f32 %v1258_v44, %v1218_v7  ;;  %1341 = vadd.xlane.f32.xlu2 %v1340_v13 }
 0x263   :  { %v1264_v3 = vpop.f32.mrf.mxu1 }
 0x264   :  { %v1284_v21 = vmax.f32 %v1259_v25, 0.0 }
 0x265   :  { %v1179_v63 = vpop.f32.mrf.mxu3 }
 0x266   :  { %v1180_v52 = vadd.f32 %v1179_v63, %v2035_v0  ;;  %v1316_v14 = vmul.f32 %v2048_v37, %v1284_v21 }
 0x268   :  { %v1221_v23 = vadd.f32 %v1220_v24, %v1180_v52  ;;  %v1344_v34 = vadd.f32 %v1343_v18, %v1316_v14 }
 0x26a   :  { %v1262_v41 = vadd.f32 %v1261_v27, %v1221_v23  ;;  %1345 = vadd.xlane.f32.xlu0 %v1344_v34 }
 0x26c   :  { %v1287_v43 = vmax.f32 %v1262_v41, 0.0 }
 0x26d   :  { %v1182_v56 = vpop.f32.mrf.mxu3 }
 0x26e   :  { %v1183_v48 = vadd.f32 %v1182_v56, %v2035_v0  ;;  %v1319_v22 = vmul.f32 %v2048_v37, %v1287_v43  ;;  %v1356_v0 = vstv %s2147_s8 }
 0x270   :  { %v1224_v45 = vadd.f32 %v1223_v57, %v1183_v48  ;;  %v1348_v28 = vadd.f32 %v1347_v5, %v1319_v22 }
 0x272   :  { %v1265_v53 = vadd.f32 %v1264_v3, %v1224_v45  ;;  %1349 = vadd.xlane.f32.xlu1 %v1348_v28 }
 0x274   :  { %v1290_v51 = vmax.f32 %v1265_v53, 0.0 }
 0x276   :  { %v1322_v61 = vmul.f32 %v2048_v37, %v1290_v51 }
 0x278   :  { %v1352_v32 = vadd.f32 %v1351_v1, %v1322_v61 }
 0x27a   :  { %1353 = vadd.xlane.f32.xlu2 %v1352_v32 }
 0x2b5   :  { %v1326_v62 = vpop.xlane.xlu2 %1325 }
 0x2b6   :  { %v1357_v30 = vadd.f32 %v1356_v0, %v1326_v62 }
 0x2b8   :  { %1366 = vst.msk [vmem:[%s2148_s9] sm:$0xff] %vm1365_vm0, %v1357_v30 }
 0x2bd   :  { %v1330_v17 = vpop.xlane.xlu0 %1329 }
 0x2be   :  { %v1358_v8 = vadd.f32 %v1356_v0, %v1330_v17 }
 0x2c0   :  { %1367 = vst.msk [vmem:[%s2148_s9 + $0x8] sm:$0xff] %vm1365_vm0, %v1358_v8 }
 0x2c5   :  { %v1334_v37 = vpop.xlane.xlu1 %1333 }
 0x2c6   :  { %v1359_v16 = vadd.f32 %v1356_v0, %v1334_v37 }
 0x2c8   :  { %1368 = vst.msk [vmem:[%s2148_s9 + $0x10] sm:$0xff] %vm1365_vm0, %v1359_v16 }
 0x2cd   :  { %v1338_v49 = vpop.xlane.xlu2 %1337 }
 0x2ce   :  { %v1360_v55 = vadd.f32 %v1356_v0, %v1338_v49 }
 0x2d0   :  { %1369 = vst.msk [vmem:[%s2148_s9 + $0x18] sm:$0xff] %vm1365_vm0, %v1360_v55 }
 0x2d5   :  { %v1342_v20 = vpop.xlane.xlu2 %1341 }
 0x2d6   :  { %v1361_v2 = vadd.f32 %v1356_v0, %v1342_v20 }
 0x2d8   :  { %1370 = vst.msk [vmem:[%s2148_s9 + $0x20] sm:$0xff] %vm1365_vm0, %v1361_v2 }
 0x2dd   :  { %v1346_v11 = vpop.xlane.xlu0 %1345 }
 0x2de   :  { %v1362_v26 = vadd.f32 %v1356_v0, %v1346_v11 }
 0x2e0   :  { %1371 = vst.msk [vmem:[%s2148_s9 + $0x28] sm:$0xff] %vm1365_vm0, %v1362_v26 }
 0x2e5   :  { %v1350_v10 = vpop.xlane.xlu1 %1349 }
 0x2e6   :  { %v1363_v44 = vadd.f32 %v1356_v0, %v1350_v10 }
 0x2e8   :  { %1372 = vst.msk [vmem:[%s2148_s9 + $0x30] sm:$0xff] %vm1365_vm0, %v1363_v44 }
 0x2ed   :  { %v1354_v31 = vpop.xlane.xlu2 %1353 }
 0x2ee   :  { %v1364_v42 = vadd.f32 %v1356_v0, %v1354_v31 }
 0x2f0   :  { %1373 = vst.msk [vmem:[%s2148_s9 + $0x38] sm:$0xff] %vm1365_vm0, %v1364_v42 }
 0x2f1   :  { %1378 = vsyncpa [#allocation4], 1 }
 0x2f2   :  { %1379 = vsyncpa [#allocation6], 1 }

</bundles_post_ra>
